<compile_context>
chip_gen: v6e
topology: v6e:2x2x1
jax: 0.10.0
libtpu: 0.0.40
codegen_flags: <defaults>
</compile_context>

<pallas_src>
import math
import functools

import jax
import jax.numpy as jnp
from jax.experimental import pallas as pl
from jax.experimental.pallas import tpu as pltpu


# ----------------------------- kernel ---------------------------------------

def _layer_norm(x, gamma, beta, eps=1e-5):
    # x: (M, E) f32, gamma/beta: (1, E)
    mean = jnp.mean(x, axis=-1, keepdims=True)
    var = jnp.mean((x - mean) ** 2, axis=-1, keepdims=True)
    return (x - mean) * jax.lax.rsqrt(var + eps) * gamma + beta


def transformer_encoder_kernel(
        x_ref,
        wqkv_ref, bqkv_ref, wo_ref, bo_ref,
        n1w_ref, n1b_ref, w1_ref, b1_ref, w2_ref, b2_ref, n2w_ref, n2b_ref,
        o_ref, act_ref,
        *, num_heads, compute_dtype):
    """One (batch-tile b, layer l) grid step.

    The running activation lives in `act_ref`, an f32 VMEM scratch of shape
    (TB*S, E) that persists across the layer axis. It is seeded from x_ref at
    l == 0; o_ref is written only at the last layer (it is VMEM-resident
    across l, so that single write is the one DMA'd back to HBM).

    Block shapes:
      x_ref / o_ref            : (TB, S, E)
      wqkv                     : (1, E, 3E)   pre-transposed, q|k|v fused,
                                               1/sqrt(Dh) folded into q cols
      wo                       : (1, E, E)    pre-transposed (y = x @ w)
      w1                       : (1, E, 4E)   pre-transposed
      w2                       : (1, 4E, E)   pre-transposed
      biases / LayerNorm params: (1, 1, dim)
    """
    l = pl.program_id(1)
    num_layers = pl.num_programs(1)

    TB, S, E = x_ref.shape
    H = num_heads
    Dh = E // H
    M = TB * S

    @pl.when(l == 0)
    def _():
        act_ref[...] = x_ref[...].reshape(M, E).astype(jnp.float32)

    x = act_ref[...]                          # (M, E) f32 running activation
    xm = x.astype(compute_dtype)

    # ---- MultiheadAttention (self-attention) --------------------------------
    # One fused QKV projection (the softmax scale is pre-folded into q).
    qkv = jnp.dot(xm, wqkv_ref[0].astype(compute_dtype),
                  preferred_element_type=jnp.float32) + bqkv_ref[0]   # (M, 3E)

    def split_heads(base):
        # static lane slices -> stack to (H, M, Dh) -> tile-aligned reshape to
        # (H*TB, S, Dh); batch index g = h*TB + b (consistent for q/k/v/ctx).
        cols = [qkv[:, base + h * Dh: base + (h + 1) * Dh] for h in range(H)]
        return jnp.stack(cols, axis=0).reshape(H * TB, S, Dh)

    qh = split_heads(0).astype(compute_dtype)
    kh = split_heads(E).astype(compute_dtype)
    vh = split_heads(2 * E).astype(compute_dtype)

    # Batched over (head, batch-row): (G, S, S)
    scores = jnp.einsum('gqd,gkd->gqk', qh, kh,
                        preferred_element_type=jnp.float32)
    scores = scores - jnp.max(scores, axis=-1, keepdims=True)
    p = jnp.exp(scores)
    p = p * pl.reciprocal(jnp.sum(p, axis=-1, keepdims=True), approx=True)

    ctx_h = jnp.einsum('gqk,gkd->gqd', p.astype(compute_dtype), vh,
                       preferred_element_type=jnp.float32)      # (G, S, Dh)
    ctx3 = ctx_h.reshape(H, M, Dh)                               # tile-aligned
    ctx = jnp.concatenate([ctx3[h] for h in range(H)], axis=-1)  # (M, E)

    attn = jnp.dot(ctx.astype(compute_dtype), wo_ref[0].astype(compute_dtype),
                   preferred_element_type=jnp.float32) + bo_ref[0]

    # dropout(attn) == attn in eval mode
    x1 = _layer_norm(x + attn, n1w_ref[0], n1b_ref[0])

    # ---- feedforward: Linear(E,4E) -> ReLU -> Linear(4E,E) ------------------
    h1 = jnp.dot(x1.astype(compute_dtype), w1_ref[0].astype(compute_dtype),
                 preferred_element_type=jnp.float32) + b1_ref[0]
    h1 = jnp.maximum(h1, 0.0)
    ff = jnp.dot(h1.astype(compute_dtype), w2_ref[0].astype(compute_dtype),
                 preferred_element_type=jnp.float32) + b2_ref[0]

    # dropout(ff) == ff in eval mode
    x2 = _layer_norm(x1 + ff, n2w_ref[0], n2b_ref[0])
    act_ref[...] = x2

    @pl.when(l == num_layers - 1)
    def _():
        o_ref[...] = act_ref[...].reshape(TB, S, E).astype(o_ref.dtype)


# ----------------------------- host-side weight packing ----------------------

_KERNEL_PARAM_ORDER = ("wqkv", "bqkv", "wo", "bo",
                       "n1w", "n1b", "w1", "b1", "w2", "b2", "n2w", "n2b")
_MATMUL_KEYS = {"wqkv", "wo", "w1", "w2"}


def pack_layer_params(layer_params, num_heads, compute_dtype=jnp.bfloat16):
    """PyTorch-layout params -> pre-transposed/fused, layer-stacked layout.

    Returns dict of arrays with a leading num_layers axis. Matmul weights are
    stored in `compute_dtype` (halves DMA bytes if bf16); everything else f32.
    The 1/sqrt(Dh) attention scale is folded into the q weight/bias.
    """
    packed = {k: [] for k in _KERNEL_PARAM_ORDER}
    for p in layer_params:
        E = p["out_w"].shape[0]
        Dh = E // num_heads
        scale = 1.0 / math.sqrt(Dh)
        in_w = p["in_w"]                              # (3E, E) packed q|k|v
        in_b = p["in_b"].reshape(3 * E)
        wq = in_w[0:E].T * scale                      # fold softmax scale
        wk = in_w[E:2 * E].T
        wv = in_w[2 * E:].T
        bq = in_b[0:E] * scale
        bk = in_b[E:2 * E]
        bv = in_b[2 * E:]
        packed["wqkv"].append(jnp.concatenate([wq, wk, wv], axis=1))     # (E,3E)
        packed["bqkv"].append(jnp.concatenate([bq, bk, bv]).reshape(1, 3 * E))
        packed["wo"].append(p["out_w"].T)             # (E, E)
        packed["bo"].append(p["out_b"].reshape(1, E))
        packed["n1w"].append(p["n1_w"].reshape(1, E))
        packed["n1b"].append(p["n1_b"].reshape(1, E))
        packed["w1"].append(p["ff1_w"].T)             # (E, 4E)
        packed["b1"].append(p["ff1_b"].reshape(1, 4 * E))
        packed["w2"].append(p["ff2_w"].T)             # (4E, E)
        packed["b2"].append(p["ff2_b"].reshape(1, E))
        packed["n2w"].append(p["n2_w"].reshape(1, E))
        packed["n2b"].append(p["n2_b"].reshape(1, E))
    return {k: jnp.stack(v, axis=0).astype(
                compute_dtype if k in _MATMUL_KEYS else jnp.float32)
            for k, v in packed.items()}


# ----------------------------- wrapper ---------------------------------------

def _pick_batch_tile(B, S):
    """Largest divisor of B keeping TB*S matmul rows ~<= 512, preferring >=2
    grid steps along the parallel batch axis (v7x has 2 TensorCores)."""
    target_rows = 512
    tb = max(1, min(B, max(1, target_rows // max(S, 1))))
    while B % tb:
        tb -= 1
    if B // tb < 2 and B > 1:
        for cand in range(tb - 1, 0, -1):
            if B % cand == 0:
                tb = cand
                break
    return tb


def _pick_vmem_limit():
    # ~96 MiB on v5e/v6e (128 MiB physical), ~48 MiB on v7x (64 MiB physical).
    try:
        cap = pltpu.get_tpu_info().vmem_capacity_bytes
    except Exception:
        cap = 64 * 1024 * 1024
    return max(32 * 1024 * 1024, min(int(cap) * 3 // 4, 100 * 1024 * 1024))


def transformer_encoder_pallas(x, layer_params, num_heads,
                               compute_dtype=jnp.bfloat16, batch_tile=None):
    B, S, E = x.shape
    L = len(layer_params)
    assert E % num_heads == 0
    assert S % 8 == 0, "S must be a multiple of 8 (f32 sublane tile)"
    if batch_tile is None:
        batch_tile = _pick_batch_tile(B, S)
    TB = batch_tile
    assert B % TB == 0

    packed = pack_layer_params(layer_params, num_heads, compute_dtype)
    weights = [packed[k] for k in _KERNEL_PARAM_ORDER]

    act_spec = pl.BlockSpec((TB, S, E), lambda b, l: (b, 0, 0))
    # All stacked weights are 3-D (L, a, b); blocks are full-extent in the
    # last two dims, indexed by the layer axis only (pipeline streams them).
    w_specs = [pl.BlockSpec((1,) + w.shape[1:], lambda b, l: (l, 0, 0))
               for w in weights]

    return pl.pallas_call(
        functools.partial(transformer_encoder_kernel,
                          num_heads=num_heads, compute_dtype=compute_dtype),
        out_shape=jax.ShapeDtypeStruct((B, S, E), x.dtype),
        grid_spec=pltpu.PrefetchScalarGridSpec(
            num_scalar_prefetch=0,
            grid=(B // TB, L),                # layer axis last (carry axis)
            in_specs=[act_spec] + w_specs,
            out_specs=act_spec,
            scratch_shapes=[pltpu.VMEM((TB * S, E), jnp.float32)],
        ),
        compiler_params=pltpu.CompilerParams(
            # batch-tile axis parallel (megacore), layer axis sequential.
            dimension_semantics=("parallel", "arbitrary"),
            vmem_limit_bytes=_pick_vmem_limit(),
        ),
    )(x, *weights)


# ----------------------------- parameter init (PyTorch layout) ---------------

def init_layer_params(key, embedding_dim):
    E = embedding_dim
    ks = jax.random.split(key, 6)
    s = 0.02
    return {
        "in_w":  (jax.random.normal(ks[0], (3 * E, E), jnp.float32) * s),
        "in_b":  (jax.random.normal(ks[1], (1, 3 * E), jnp.float32) * s),
        "out_w": (jax.random.normal(ks[2], (E, E), jnp.float32) * s),
        "out_b": jnp.zeros((1, E), jnp.float32),
        "n1_w":  jnp.ones((1, E), jnp.float32),
        "n1_b":  jnp.zeros((1, E), jnp.float32),
        "ff1_w": (jax.random.normal(ks[3], (4 * E, E), jnp.float32) * s),
        "ff1_b": (jax.random.normal(ks[4], (1, 4 * E), jnp.float32) * s),
        "ff2_w": (jax.random.normal(ks[5], (E, 4 * E), jnp.float32) * s),
        "ff2_b": jnp.zeros((1, E), jnp.float32),
        "n2_w":  jnp.ones((1, E), jnp.float32),
        "n2_b":  jnp.zeros((1, E), jnp.float32),
    }


# ----------------------------- pure-JAX reference -----------------------------

def _ref_layer_norm(x, g, b, eps=1e-5):
    mean = jnp.mean(x, axis=-1, keepdims=True)
    var = jnp.mean((x - mean) ** 2, axis=-1, keepdims=True)
    return (x - mean) * jax.lax.rsqrt(var + eps) * g + b


def ref_layer(x, p, num_heads):
    B, S, E = x.shape
    Dh = E // num_heads
    qkv = x @ p["in_w"].T + p["in_b"][0]
    q, k, v = jnp.split(qkv, 3, axis=-1)

    def heads(t):
        return t.reshape(B, S, num_heads, Dh).transpose(0, 2, 1, 3)

    qh, kh, vh = heads(q), heads(k), heads(v)
    scores = jnp.einsum("bhqd,bhkd->bhqk", qh, kh) / jnp.sqrt(jnp.float32(Dh))
    attn = jax.nn.softmax(scores, axis=-1)
    out = jnp.einsum("bhqk,bhkd->bhqd", attn, vh)
    out = out.transpose(0, 2, 1, 3).reshape(B, S, E)
    out = out @ p["out_w"].T + p["out_b"][0]
    x1 = _ref_layer_norm(x + out, p["n1_w"][0], p["n1_b"][0])
    h = jax.nn.relu(x1 @ p["ff1_w"].T + p["ff1_b"][0])
    ff = h @ p["ff2_w"].T + p["ff2_b"][0]
    return _ref_layer_norm(x1 + ff, p["n2_w"][0], p["n2_b"][0])


def ref_encoder(x, layer_params, num_heads):
    for p in layer_params:
        x = ref_layer(x, p, num_heads)
    return x


# ----------------------------- main -------------------------------------------

if __name__ == "__main__":
    B, S, E = 4, 8, 32
    num_heads = 4
    num_layers = 2

    root = jax.random.PRNGKey(0)
    kx, kp = jax.random.split(root)
    x = jax.random.normal(kx, (B, S, E), jnp.float32)

    layer_keys = jax.random.split(kp, num_layers)
    layer_params = [init_layer_params(k, E) for k in layer_keys]

    # compute_dtype=jnp.bfloat16 (the wrapper default) halves MXU-operand /
    # weight-DMA bytes on v6e/v7x; f32 is used here for the tight reference
    # comparison. batch_tile=2 exercises batch folding with 2 parallel steps.
    out = transformer_encoder_pallas(x, layer_params, num_heads,
                                     compute_dtype=jnp.float32, batch_tile=2)
    out = jax.block_until_ready(out)

    expected = jax.block_until_ready(ref_encoder(x, layer_params, num_heads))
    assert out.shape == (B, S, E)
    # Tolerance accommodates the approximate (EUP) reciprocal in the softmax.
    assert jnp.allclose(out, expected, rtol=5e-3, atol=5e-3), (
        float(jnp.max(jnp.abs(out - expected))))

    print("KERNEL_OK")
</pallas_src>

<mosaic_0001>
module attributes {stable_mosaic.version = 11 : i64} {
  func.func @transformer_encoder_kernel(%arg0: i32, %arg1: i32, %arg2: memref<2x8x32xf32, #tpu.memory_space<vmem>>, %arg3: memref<1x32x96xf32, #tpu.memory_space<vmem>>, %arg4: memref<1x1x96xf32, #tpu.memory_space<vmem>>, %arg5: memref<1x32x32xf32, #tpu.memory_space<vmem>>, %arg6: memref<1x1x32xf32, #tpu.memory_space<vmem>>, %arg7: memref<1x1x32xf32, #tpu.memory_space<vmem>>, %arg8: memref<1x1x32xf32, #tpu.memory_space<vmem>>, %arg9: memref<1x32x128xf32, #tpu.memory_space<vmem>>, %arg10: memref<1x1x128xf32, #tpu.memory_space<vmem>>, %arg11: memref<1x128x32xf32, #tpu.memory_space<vmem>>, %arg12: memref<1x1x32xf32, #tpu.memory_space<vmem>>, %arg13: memref<1x1x32xf32, #tpu.memory_space<vmem>>, %arg14: memref<1x1x32xf32, #tpu.memory_space<vmem>>, %arg15: memref<2x8x32xf32, #tpu.memory_space<vmem>>, %arg16: memref<16x32xf32, #tpu.memory_space<vmem>>) attributes {dimension_semantics = [#tpu.dimension_semantics<parallel>, #tpu.dimension_semantics<arbitrary>], iteration_bounds = array<i64: 2, 2>, scalar_prefetch = 0 : i64, scratch_operands = 1 : i64, tpu.core_type = #tpu.core_type<tc>, window_params = [{transform_indices = @transform_0, window_bounds = array<i64: 2, 8, 32>}, {transform_indices = @transform_1, window_bounds = array<i64: 1, 32, 96>}, {transform_indices = @transform_2, window_bounds = array<i64: 1, 1, 96>}, {transform_indices = @transform_3, window_bounds = array<i64: 1, 32, 32>}, {transform_indices = @transform_4, window_bounds = array<i64: 1, 1, 32>}, {transform_indices = @transform_5, window_bounds = array<i64: 1, 1, 32>}, {transform_indices = @transform_6, window_bounds = array<i64: 1, 1, 32>}, {transform_indices = @transform_7, window_bounds = array<i64: 1, 32, 128>}, {transform_indices = @transform_8, window_bounds = array<i64: 1, 1, 128>}, {transform_indices = @transform_9, window_bounds = array<i64: 1, 128, 32>}, {transform_indices = @transform_10, window_bounds = array<i64: 1, 1, 32>}, {transform_indices = @transform_11, window_bounds = array<i64: 1, 1, 32>}, {transform_indices = @transform_12, window_bounds = array<i64: 1, 1, 32>}, {transform_indices = @transform_13, window_bounds = array<i64: 2, 8, 32>}]} {
    %c0_i32 = arith.constant 0 : i32
    %0 = arith.cmpi eq, %arg1, %c0_i32 : i32
    %1 = arith.extui %0 : i1 to i32
    %c0_i32_0 = arith.constant 0 : i32
    %2 = arith.cmpi ne, %1, %c0_i32_0 : i32
    scf.if %2 {
      %c0_59 = arith.constant 0 : index
      %c0_60 = arith.constant 0 : index
      %c0_61 = arith.constant 0 : index
      %144 = vector.load %arg2[%c0_59, %c0_60, %c0_61] : memref<2x8x32xf32, #tpu.memory_space<vmem>>, vector<2x8x32xf32>
      %145 = vector.shape_cast %144 : vector<2x8x32xf32> to vector<16x32xf32>
      %c0_62 = arith.constant 0 : index
      %c0_63 = arith.constant 0 : index
      %146 = vector.load %arg16[%c0_62, %c0_63] : memref<16x32xf32, #tpu.memory_space<vmem>>, vector<16x32xf32>
      tpu.vector_store %arg16[%c0_62, %c0_63], %145 {strides = array<i32>} : memref<16x32xf32, #tpu.memory_space<vmem>>, vector<16x32xf32>,
    } else {
    }
    %c0 = arith.constant 0 : index
    %c0_1 = arith.constant 0 : index
    %3 = vector.load %arg16[%c0, %c0_1] : memref<16x32xf32, #tpu.memory_space<vmem>>, vector<16x32xf32>
    %c0_2 = arith.constant 0 : index
    %c0_3 = arith.constant 0 : index
    %c0_4 = arith.constant 0 : index
    %4 = vector.load %arg3[%c0_2, %c0_3, %c0_4] : memref<1x32x96xf32, #tpu.memory_space<vmem>>, vector<1x32x96xf32>
    %5 = vector.shape_cast %4 : vector<1x32x96xf32> to vector<32x96xf32>
    %cst = arith.constant dense<0.000000e+00> : vector<16x96xf32>
    %6 = tpu.matmul %3, %5, %cst {dimension_numbers = #tpu.dot_dimension_numbers<[1], [0], [0], [1], [0, 0, 1, 1], [], []>} : vector<16x32xf32>, vector<32x96xf32>, vector<16x96xf32> -> vector<16x96xf32>
    %c0_5 = arith.constant 0 : index
    %c0_6 = arith.constant 0 : index
    %c0_7 = arith.constant 0 : index
    %7 = vector.load %arg4[%c0_5, %c0_6, %c0_7] : memref<1x1x96xf32, #tpu.memory_space<vmem>>, vector<1x1x96xf32>
    %8 = vector.shape_cast %7 : vector<1x1x96xf32> to vector<1x96xf32>
    %9 = vector.broadcast %8 : vector<1x96xf32> to vector<16x96xf32>
    %10 = arith.addf %6, %9 : vector<16x96xf32>
    %11 = vector.extract_strided_slice %10 {offsets = [0, 0], sizes = [16, 8], strides = [1, 1]} : vector<16x96xf32> to vector<16x8xf32>
    %12 = vector.extract_strided_slice %10 {offsets = [0, 8], sizes = [16, 8], strides = [1, 1]} : vector<16x96xf32> to vector<16x8xf32>
    %13 = vector.extract_strided_slice %10 {offsets = [0, 16], sizes = [16, 8], strides = [1, 1]} : vector<16x96xf32> to vector<16x8xf32>
    %14 = vector.extract_strided_slice %10 {offsets = [0, 24], sizes = [16, 8], strides = [1, 1]} : vector<16x96xf32> to vector<16x8xf32>
    %15 = vector.shape_cast %11 : vector<16x8xf32> to vector<1x16x8xf32>
    %16 = vector.shape_cast %12 : vector<16x8xf32> to vector<1x16x8xf32>
    %17 = vector.shape_cast %13 : vector<16x8xf32> to vector<1x16x8xf32>
    %18 = vector.shape_cast %14 : vector<16x8xf32> to vector<1x16x8xf32>
    %19 = tpu.concatenate %15, %16, %17, %18 in 0 : vector<1x16x8xf32>, vector<1x16x8xf32>, vector<1x16x8xf32>, vector<1x16x8xf32> -> vector<4x16x8xf32>
    %20 = vector.shape_cast %19 : vector<4x16x8xf32> to vector<8x8x8xf32>
    %21 = vector.extract_strided_slice %10 {offsets = [0, 32], sizes = [16, 8], strides = [1, 1]} : vector<16x96xf32> to vector<16x8xf32>
    %22 = vector.extract_strided_slice %10 {offsets = [0, 40], sizes = [16, 8], strides = [1, 1]} : vector<16x96xf32> to vector<16x8xf32>
    %23 = vector.extract_strided_slice %10 {offsets = [0, 48], sizes = [16, 8], strides = [1, 1]} : vector<16x96xf32> to vector<16x8xf32>
    %24 = vector.extract_strided_slice %10 {offsets = [0, 56], sizes = [16, 8], strides = [1, 1]} : vector<16x96xf32> to vector<16x8xf32>
    %25 = vector.shape_cast %21 : vector<16x8xf32> to vector<1x16x8xf32>
    %26 = vector.shape_cast %22 : vector<16x8xf32> to vector<1x16x8xf32>
    %27 = vector.shape_cast %23 : vector<16x8xf32> to vector<1x16x8xf32>
    %28 = vector.shape_cast %24 : vector<16x8xf32> to vector<1x16x8xf32>
    %29 = tpu.concatenate %25, %26, %27, %28 in 0 : vector<1x16x8xf32>, vector<1x16x8xf32>, vector<1x16x8xf32>, vector<1x16x8xf32> -> vector<4x16x8xf32>
    %30 = vector.shape_cast %29 : vector<4x16x8xf32> to vector<8x8x8xf32>
    %31 = vector.extract_strided_slice %10 {offsets = [0, 64], sizes = [16, 8], strides = [1, 1]} : vector<16x96xf32> to vector<16x8xf32>
    %32 = vector.extract_strided_slice %10 {offsets = [0, 72], sizes = [16, 8], strides = [1, 1]} : vector<16x96xf32> to vector<16x8xf32>
    %33 = vector.extract_strided_slice %10 {offsets = [0, 80], sizes = [16, 8], strides = [1, 1]} : vector<16x96xf32> to vector<16x8xf32>
    %34 = vector.extract_strided_slice %10 {offsets = [0, 88], sizes = [16, 8], strides = [1, 1]} : vector<16x96xf32> to vector<16x8xf32>
    %35 = vector.shape_cast %31 : vector<16x8xf32> to vector<1x16x8xf32>
    %36 = vector.shape_cast %32 : vector<16x8xf32> to vector<1x16x8xf32>
    %37 = vector.shape_cast %33 : vector<16x8xf32> to vector<1x16x8xf32>
    %38 = vector.shape_cast %34 : vector<16x8xf32> to vector<1x16x8xf32>
    %39 = tpu.concatenate %35, %36, %37, %38 in 0 : vector<1x16x8xf32>, vector<1x16x8xf32>, vector<1x16x8xf32>, vector<1x16x8xf32> -> vector<4x16x8xf32>
    %40 = vector.shape_cast %39 : vector<4x16x8xf32> to vector<8x8x8xf32>
    "tpu.trace_start"() <{level = 10 : i32, message = "gqd,gkd->gqk"}> : () -> ()
    %cst_8 = arith.constant dense<0.000000e+00> : vector<8x8x8xf32>
    %41 = tpu.matmul %20, %30, %cst_8 {dimension_numbers = #tpu.dot_dimension_numbers<[2], [2], [1], [1], [0, 0, 0, 1, 1, 1], [0], [0]>} : vector<8x8x8xf32>, vector<8x8x8xf32>, vector<8x8x8xf32> -> vector<8x8x8xf32>
    "tpu.trace_stop"() : () -> ()
    %cst_9 = arith.constant dense<0xFF800000> : vector<8x8xf32>
    %42 = vector.multi_reduction <maximumf>, %41, %cst_9 [2] : vector<8x8x8xf32> to vector<8x8xf32>
    %43 = vector.shape_cast %42 : vector<8x8xf32> to vector<8x8x1xf32>
    %44 = vector.broadcast %43 : vector<8x8x1xf32> to vector<8x8x8xf32>
    %45 = arith.subf %41, %44 : vector<8x8x8xf32>
    %46 = math.exp %45 : vector<8x8x8xf32>
    %cst_10 = arith.constant dense<0.000000e+00> : vector<8x8xf32>
    %47 = vector.multi_reduction <add>, %46, %cst_10 [2] : vector<8x8x8xf32> to vector<8x8xf32>
    %48 = vector.shape_cast %47 : vector<8x8xf32> to vector<8x8x1xf32>
    %49 = tpu.reciprocal %48 {approx = true} : vector<8x8x1xf32> -> vector<8x8x1xf32>
    %50 = vector.broadcast %49 : vector<8x8x1xf32> to vector<8x8x8xf32>
    %51 = arith.mulf %46, %50 : vector<8x8x8xf32>
    "tpu.trace_start"() <{level = 10 : i32, message = "gqk,gkd->gqd"}> : () -> ()
    %cst_11 = arith.constant dense<0.000000e+00> : vector<8x8x8xf32>
    %52 = tpu.matmul %51, %40, %cst_11 {dimension_numbers = #tpu.dot_dimension_numbers<[2], [1], [1], [2], [0, 0, 0, 1, 1, 2], [0], [0]>} : vector<8x8x8xf32>, vector<8x8x8xf32>, vector<8x8x8xf32> -> vector<8x8x8xf32>
    "tpu.trace_stop"() : () -> ()
    %53 = vector.shape_cast %52 : vector<8x8x8xf32> to vector<4x16x8xf32>
    %54 = vector.extract_strided_slice %53 {offsets = [0, 0, 0], sizes = [1, 16, 8], strides = [1, 1, 1]} : vector<4x16x8xf32> to vector<1x16x8xf32>
    %55 = vector.shape_cast %54 : vector<1x16x8xf32> to vector<16x8xf32>
    %56 = vector.extract_strided_slice %53 {offsets = [1, 0, 0], sizes = [1, 16, 8], strides = [1, 1, 1]} : vector<4x16x8xf32> to vector<1x16x8xf32>
    %57 = vector.shape_cast %56 : vector<1x16x8xf32> to vector<16x8xf32>
    %58 = vector.extract_strided_slice %53 {offsets = [2, 0, 0], sizes = [1, 16, 8], strides = [1, 1, 1]} : vector<4x16x8xf32> to vector<1x16x8xf32>
    %59 = vector.shape_cast %58 : vector<1x16x8xf32> to vector<16x8xf32>
    %60 = vector.extract_strided_slice %53 {offsets = [3, 0, 0], sizes = [1, 16, 8], strides = [1, 1, 1]} : vector<4x16x8xf32> to vector<1x16x8xf32>
    %61 = vector.shape_cast %60 : vector<1x16x8xf32> to vector<16x8xf32>
    %62 = tpu.concatenate %55, %57, %59, %61 in 1 : vector<16x8xf32>, vector<16x8xf32>, vector<16x8xf32>, vector<16x8xf32> -> vector<16x32xf32>
    %c0_12 = arith.constant 0 : index
    %c0_13 = arith.constant 0 : index
    %c0_14 = arith.constant 0 : index
    %63 = vector.load %arg5[%c0_12, %c0_13, %c0_14] : memref<1x32x32xf32, #tpu.memory_space<vmem>>, vector<1x32x32xf32>
    %64 = vector.shape_cast %63 : vector<1x32x32xf32> to vector<32x32xf32>
    %cst_15 = arith.constant dense<0.000000e+00> : vector<16x32xf32>
    %65 = tpu.matmul %62, %64, %cst_15 {dimension_numbers = #tpu.dot_dimension_numbers<[1], [0], [0], [1], [0, 0, 1, 1], [], []>} : vector<16x32xf32>, vector<32x32xf32>, vector<16x32xf32> -> vector<16x32xf32>
    %c0_16 = arith.constant 0 : index
    %c0_17 = arith.constant 0 : index
    %c0_18 = arith.constant 0 : index
    %66 = vector.load %arg6[%c0_16, %c0_17, %c0_18] : memref<1x1x32xf32, #tpu.memory_space<vmem>>, vector<1x1x32xf32>
    %67 = vector.shape_cast %66 : vector<1x1x32xf32> to vector<1x32xf32>
    %68 = vector.broadcast %67 : vector<1x32xf32> to vector<16x32xf32>
    %69 = arith.addf %65, %68 : vector<16x32xf32>
    %70 = arith.addf %3, %69 : vector<16x32xf32>
    %c0_19 = arith.constant 0 : index
    %c0_20 = arith.constant 0 : index
    %c0_21 = arith.constant 0 : index
    %71 = vector.load %arg7[%c0_19, %c0_20, %c0_21] : memref<1x1x32xf32, #tpu.memory_space<vmem>>, vector<1x1x32xf32>
    %72 = vector.shape_cast %71 : vector<1x1x32xf32> to vector<1x32xf32>
    %c0_22 = arith.constant 0 : index
    %c0_23 = arith.constant 0 : index
    %c0_24 = arith.constant 0 : index
    %73 = vector.load %arg8[%c0_22, %c0_23, %c0_24] : memref<1x1x32xf32, #tpu.memory_space<vmem>>, vector<1x1x32xf32>
    %74 = vector.shape_cast %73 : vector<1x1x32xf32> to vector<1x32xf32>
    %cst_25 = arith.constant dense<0.000000e+00> : vector<16xf32>
    %75 = vector.multi_reduction <add>, %70, %cst_25 [1] : vector<16x32xf32> to vector<16xf32>
    %76 = vector.shape_cast %75 : vector<16xf32> to vector<16x1xf32>
    %cst_26 = arith.constant 3.200000e+01 : f32
    %77 = vector.broadcast %cst_26 : f32 to vector<16x1xf32>
    %78 = arith.divf %76, %77 : vector<16x1xf32>
    %79 = vector.broadcast %78 : vector<16x1xf32> to vector<16x32xf32>
    %80 = arith.subf %70, %79 : vector<16x32xf32>
    %81 = arith.mulf %80, %80 : vector<16x32xf32>
    %cst_27 = arith.constant dense<0.000000e+00> : vector<16xf32>
    %82 = vector.multi_reduction <add>, %81, %cst_27 [1] : vector<16x32xf32> to vector<16xf32>
    %83 = vector.shape_cast %82 : vector<16xf32> to vector<16x1xf32>
    %cst_28 = arith.constant 3.200000e+01 : f32
    %84 = vector.broadcast %cst_28 : f32 to vector<16x1xf32>
    %85 = arith.divf %83, %84 : vector<16x1xf32>
    %86 = vector.broadcast %78 : vector<16x1xf32> to vector<16x32xf32>
    %87 = arith.subf %70, %86 : vector<16x32xf32>
    %cst_29 = arith.constant 9.99999974E-6 : f32
    %88 = vector.broadcast %cst_29 : f32 to vector<16x1xf32>
    %89 = arith.addf %85, %88 : vector<16x1xf32>
    %90 = math.rsqrt %89 : vector<16x1xf32>
    %91 = vector.broadcast %90 : vector<16x1xf32> to vector<16x32xf32>
    %92 = arith.mulf %87, %91 : vector<16x32xf32>
    %93 = vector.broadcast %72 : vector<1x32xf32> to vector<16x32xf32>
    %94 = arith.mulf %92, %93 : vector<16x32xf32>
    %95 = vector.broadcast %74 : vector<1x32xf32> to vector<16x32xf32>
    %96 = arith.addf %94, %95 : vector<16x32xf32>
    %c0_30 = arith.constant 0 : index
    %c0_31 = arith.constant 0 : index
    %c0_32 = arith.constant 0 : index
    %97 = vector.load %arg9[%c0_30, %c0_31, %c0_32] : memref<1x32x128xf32, #tpu.memory_space<vmem>>, vector<1x32x128xf32>
    %98 = vector.shape_cast %97 : vector<1x32x128xf32> to vector<32x128xf32>
    %cst_33 = arith.constant dense<0.000000e+00> : vector<16x128xf32>
    %99 = tpu.matmul %96, %98, %cst_33 {dimension_numbers = #tpu.dot_dimension_numbers<[1], [0], [0], [1], [0, 0, 1, 1], [], []>} : vector<16x32xf32>, vector<32x128xf32>, vector<16x128xf32> -> vector<16x128xf32>
    %c0_34 = arith.constant 0 : index
    %c0_35 = arith.constant 0 : index
    %c0_36 = arith.constant 0 : index
    %100 = vector.load %arg10[%c0_34, %c0_35, %c0_36] : memref<1x1x128xf32, #tpu.memory_space<vmem>>, vector<1x1x128xf32>
    %101 = vector.shape_cast %100 : vector<1x1x128xf32> to vector<1x128xf32>
    %102 = vector.broadcast %101 : vector<1x128xf32> to vector<16x128xf32>
    %103 = arith.addf %99, %102 : vector<16x128xf32>
    %cst_37 = arith.constant 0.000000e+00 : f32
    %104 = vector.broadcast %cst_37 : f32 to vector<16x128xf32>
    %105 = arith.maximumf %103, %104 : vector<16x128xf32>
    %c0_38 = arith.constant 0 : index
    %c0_39 = arith.constant 0 : index
    %c0_40 = arith.constant 0 : index
    %106 = vector.load %arg11[%c0_38, %c0_39, %c0_40] : memref<1x128x32xf32, #tpu.memory_space<vmem>>, vector<1x128x32xf32>
    %107 = vector.shape_cast %106 : vector<1x128x32xf32> to vector<128x32xf32>
    %cst_41 = arith.constant dense<0.000000e+00> : vector<16x32xf32>
    %108 = tpu.matmul %105, %107, %cst_41 {dimension_numbers = #tpu.dot_dimension_numbers<[1], [0], [0], [1], [0, 0, 1, 1], [], []>} : vector<16x128xf32>, vector<128x32xf32>, vector<16x32xf32> -> vector<16x32xf32>
    %c0_42 = arith.constant 0 : index
    %c0_43 = arith.constant 0 : index
    %c0_44 = arith.constant 0 : index
    %109 = vector.load %arg12[%c0_42, %c0_43, %c0_44] : memref<1x1x32xf32, #tpu.memory_space<vmem>>, vector<1x1x32xf32>
    %110 = vector.shape_cast %109 : vector<1x1x32xf32> to vector<1x32xf32>
    %111 = vector.broadcast %110 : vector<1x32xf32> to vector<16x32xf32>
    %112 = arith.addf %108, %111 : vector<16x32xf32>
    %113 = arith.addf %96, %112 : vector<16x32xf32>
    %c0_45 = arith.constant 0 : index
    %c0_46 = arith.constant 0 : index
    %c0_47 = arith.constant 0 : index
    %114 = vector.load %arg13[%c0_45, %c0_46, %c0_47] : memref<1x1x32xf32, #tpu.memory_space<vmem>>, vector<1x1x32xf32>
    %115 = vector.shape_cast %114 : vector<1x1x32xf32> to vector<1x32xf32>
    %c0_48 = arith.constant 0 : index
    %c0_49 = arith.constant 0 : index
    %c0_50 = arith.constant 0 : index
    %116 = vector.load %arg14[%c0_48, %c0_49, %c0_50] : memref<1x1x32xf32, #tpu.memory_space<vmem>>, vector<1x1x32xf32>
    %117 = vector.shape_cast %116 : vector<1x1x32xf32> to vector<1x32xf32>
    %cst_51 = arith.constant dense<0.000000e+00> : vector<16xf32>
    %118 = vector.multi_reduction <add>, %113, %cst_51 [1] : vector<16x32xf32> to vector<16xf32>
    %119 = vector.shape_cast %118 : vector<16xf32> to vector<16x1xf32>
    %cst_52 = arith.constant 3.200000e+01 : f32
    %120 = vector.broadcast %cst_52 : f32 to vector<16x1xf32>
    %121 = arith.divf %119, %120 : vector<16x1xf32>
    %122 = vector.broadcast %121 : vector<16x1xf32> to vector<16x32xf32>
    %123 = arith.subf %113, %122 : vector<16x32xf32>
    %124 = arith.mulf %123, %123 : vector<16x32xf32>
    %cst_53 = arith.constant dense<0.000000e+00> : vector<16xf32>
    %125 = vector.multi_reduction <add>, %124, %cst_53 [1] : vector<16x32xf32> to vector<16xf32>
    %126 = vector.shape_cast %125 : vector<16xf32> to vector<16x1xf32>
    %cst_54 = arith.constant 3.200000e+01 : f32
    %127 = vector.broadcast %cst_54 : f32 to vector<16x1xf32>
    %128 = arith.divf %126, %127 : vector<16x1xf32>
    %129 = vector.broadcast %121 : vector<16x1xf32> to vector<16x32xf32>
    %130 = arith.subf %113, %129 : vector<16x32xf32>
    %cst_55 = arith.constant 9.99999974E-6 : f32
    %131 = vector.broadcast %cst_55 : f32 to vector<16x1xf32>
    %132 = arith.addf %128, %131 : vector<16x1xf32>
    %133 = math.rsqrt %132 : vector<16x1xf32>
    %134 = vector.broadcast %133 : vector<16x1xf32> to vector<16x32xf32>
    %135 = arith.mulf %130, %134 : vector<16x32xf32>
    %136 = vector.broadcast %115 : vector<1x32xf32> to vector<16x32xf32>
    %137 = arith.mulf %135, %136 : vector<16x32xf32>
    %138 = vector.broadcast %117 : vector<1x32xf32> to vector<16x32xf32>
    %139 = arith.addf %137, %138 : vector<16x32xf32>
    %c0_56 = arith.constant 0 : index
    %c0_57 = arith.constant 0 : index
    %140 = vector.load %arg16[%c0_56, %c0_57] : memref<16x32xf32, #tpu.memory_space<vmem>>, vector<16x32xf32>
    tpu.vector_store %arg16[%c0_56, %c0_57], %139 {strides = array<i32>} : memref<16x32xf32, #tpu.memory_space<vmem>>, vector<16x32xf32>,
    %c1_i32 = arith.constant 1 : i32
    %141 = arith.cmpi eq, %arg1, %c1_i32 : i32
    %142 = arith.extui %141 : i1 to i32
    %c0_i32_58 = arith.constant 0 : i32
    %143 = arith.cmpi ne, %142, %c0_i32_58 : i32
    scf.if %143 {
      %c0_59 = arith.constant 0 : index
      %c0_60 = arith.constant 0 : index
      %144 = vector.load %arg16[%c0_59, %c0_60] : memref<16x32xf32, #tpu.memory_space<vmem>>, vector<16x32xf32>
      %145 = vector.shape_cast %144 : vector<16x32xf32> to vector<2x8x32xf32>
      %c0_61 = arith.constant 0 : index
      %c0_62 = arith.constant 0 : index
      %c0_63 = arith.constant 0 : index
      %146 = vector.load %arg15[%c0_61, %c0_62, %c0_63] : memref<2x8x32xf32, #tpu.memory_space<vmem>>, vector<2x8x32xf32>
      tpu.vector_store %arg15[%c0_61, %c0_62, %c0_63], %145 {strides = array<i32>} : memref<2x8x32xf32, #tpu.memory_space<vmem>>, vector<2x8x32xf32>,
    } else {
    }
    return
  }
  func.func @transform_0(%arg0: i32, %arg1: i32) -> (i32, i32, i32) {
    %c0_i32 = arith.constant 0 : i32
    %c0_i32_0 = arith.constant 0 : i32
    %c0_i32_1 = arith.constant 0 : i32
    return %arg0, %c0_i32, %c0_i32_0 : i32, i32, i32
  }
  func.func @transform_1(%arg0: i32, %arg1: i32) -> (i32, i32, i32) {
    %c0_i32 = arith.constant 0 : i32
    %c0_i32_0 = arith.constant 0 : i32
    %c0_i32_1 = arith.constant 0 : i32
    return %arg1, %c0_i32, %c0_i32_0 : i32, i32, i32
  }
  func.func @transform_2(%arg0: i32, %arg1: i32) -> (i32, i32, i32) {
    %c0_i32 = arith.constant 0 : i32
    %c0_i32_0 = arith.constant 0 : i32
    %c0_i32_1 = arith.constant 0 : i32
    return %arg1, %c0_i32, %c0_i32_0 : i32, i32, i32
  }
  func.func @transform_3(%arg0: i32, %arg1: i32) -> (i32, i32, i32) {
    %c0_i32 = arith.constant 0 : i32
    %c0_i32_0 = arith.constant 0 : i32
    %c0_i32_1 = arith.constant 0 : i32
    return %arg1, %c0_i32, %c0_i32_0 : i32, i32, i32
  }
  func.func @transform_4(%arg0: i32, %arg1: i32) -> (i32, i32, i32) {
    %c0_i32 = arith.constant 0 : i32
    %c0_i32_0 = arith.constant 0 : i32
    %c0_i32_1 = arith.constant 0 : i32
    return %arg1, %c0_i32, %c0_i32_0 : i32, i32, i32
  }
  func.func @transform_5(%arg0: i32, %arg1: i32) -> (i32, i32, i32) {
    %c0_i32 = arith.constant 0 : i32
    %c0_i32_0 = arith.constant 0 : i32
    %c0_i32_1 = arith.constant 0 : i32
    return %arg1, %c0_i32, %c0_i32_0 : i32, i32, i32
  }
  func.func @transform_6(%arg0: i32, %arg1: i32) -> (i32, i32, i32) {
    %c0_i32 = arith.constant 0 : i32
    %c0_i32_0 = arith.constant 0 : i32
    %c0_i32_1 = arith.constant 0 : i32
    return %arg1, %c0_i32, %c0_i32_0 : i32, i32, i32
  }
  func.func @transform_7(%arg0: i32, %arg1: i32) -> (i32, i32, i32) {
    %c0_i32 = arith.constant 0 : i32
    %c0_i32_0 = arith.constant 0 : i32
    %c0_i32_1 = arith.constant 0 : i32
    return %arg1, %c0_i32, %c0_i32_0 : i32, i32, i32
  }
  func.func @transform_8(%arg0: i32, %arg1: i32) -> (i32, i32, i32) {
    %c0_i32 = arith.constant 0 : i32
    %c0_i32_0 = arith.constant 0 : i32
    %c0_i32_1 = arith.constant 0 : i32
    return %arg1, %c0_i32, %c0_i32_0 : i32, i32, i32
  }
  func.func @transform_9(%arg0: i32, %arg1: i32) -> (i32, i32, i32) {
    %c0_i32 = arith.constant 0 : i32
    %c0_i32_0 = arith.constant 0 : i32
    %c0_i32_1 = arith.constant 0 : i32
    return %arg1, %c0_i32, %c0_i32_0 : i32, i32, i32
  }
  func.func @transform_10(%arg0: i32, %arg1: i32) -> (i32, i32, i32) {
    %c0_i32 = arith.constant 0 : i32
    %c0_i32_0 = arith.constant 0 : i32
    %c0_i32_1 = arith.constant 0 : i32
    return %arg1, %c0_i32, %c0_i32_0 : i32, i32, i32
  }
  func.func @transform_11(%arg0: i32, %arg1: i32) -> (i32, i32, i32) {
    %c0_i32 = arith.constant 0 : i32
    %c0_i32_0 = arith.constant 0 : i32
    %c0_i32_1 = arith.constant 0 : i32
    return %arg1, %c0_i32, %c0_i32_0 : i32, i32, i32
  }
  func.func @transform_12(%arg0: i32, %arg1: i32) -> (i32, i32, i32) {
    %c0_i32 = arith.constant 0 : i32
    %c0_i32_0 = arith.constant 0 : i32
    %c0_i32_1 = arith.constant 0 : i32
    return %arg1, %c0_i32, %c0_i32_0 : i32, i32, i32
  }
  func.func @transform_13(%arg0: i32, %arg1: i32) -> (i32, i32, i32) {
    %c0_i32 = arith.constant 0 : i32
    %c0_i32_0 = arith.constant 0 : i32
    %c0_i32_1 = arith.constant 0 : i32
    return %arg0, %c0_i32, %c0_i32_0 : i32, i32, i32
  }
}

</mosaic_0001>

<bundles_post_ra>
// kernel: tpu_custom_call.1
= control target key start
LH: loop header
LB: loop body
LE: loop exit
PB: predicated region body
PF: predicated region fallthrough
CT: control target
= control target key end

     0   :  { %s3744_s0 = inlined_call_operand.vmem [shape: f32[4,8,32], index: 0, kind: input, shape index: {}]   ;;  %s3745_s1 = inlined_call_operand.vmem [shape: f32[2,32,96], index: 1, kind: input, shape index: {}]   ;;  %s3746_s2 = inlined_call_operand.vmem [shape: f32[2,1,96], index: 2, kind: input, shape index: {}]   ;;  %s3747_s3 = inlined_call_operand.vmem [shape: f32[2,32,32], index: 3, kind: input, shape index: {}]   ;;  %s3748_s4 = inlined_call_operand.vmem [shape: f32[2,1,32], index: 4, kind: input, shape index: {}]   ;;  %s3749_s5 = inlined_call_operand.vmem [shape: f32[2,1,32], index: 5, kind: input, shape index: {}]   ;;  %s3750_s6 = inlined_call_operand.vmem [shape: f32[2,1,32], index: 6, kind: input, shape index: {}]   ;;  %s3751_s7 = inlined_call_operand.vmem [shape: f32[2,32,128], index: 7, kind: input, shape index: {}]   ;;  %s3752_s8 = inlined_call_operand.vmem [shape: f32[2,1,128], index: 8, kind: input, shape index: {}]   ;;  %s3753_s9 = inlined_call_operand.vmem [shape: f32[2,128,32], index: 9, kind: input, shape index: {}]   ;;  %s3754_s10 = inlined_call_operand.vmem [shape: f32[2,1,32], index: 10, kind: input, shape index: {}]   ;;  %s3755_s11 = inlined_call_operand.vmem [shape: f32[2,1,32], index: 11, kind: input, shape index: {}]   ;;  %s3756_s12 = inlined_call_operand.vmem [shape: f32[2,1,32], index: 12, kind: input, shape index: {}]   ;;  %s3757_s13 = inlined_call_operand.hbm [shape: f32[4,8,32], index: 13, kind: output, shape index: {}]  }
   0x1   :  { %3774 = sst [smem:[#allocation20_spill]] %s3744_s0 }
   0x2   :  { %3775 = sst [smem:[#allocation21_spill]] %s3745_s1 }
   0x3   :  { %3776 = sst [smem:[#allocation22_spill]] %s3747_s3 }
   0x4   :  { %3777 = sst [smem:[#allocation23_spill]] %s3757_s13 }
   0x5   :  { %18 = vsyncpa [#allocation4], 0 }
   0x6   :  { %20 = vsyncpa [#allocation4 + $0x1], 0  ;;  %s3275_s25 = smov 0   ;;  %s3277_s26 = smov 0  }
   0x7   :  { %s3279_s27 = smov 0   ;;  %s3281_s28 = smov 0  }
   0x8   :  { %s3283_s29 = smov 0   ;;  %s3285_s30 = smov 0  }
   0x9   :  { %s3287_s14 = smov 0   ;;  %s3289_s15 = smov 0  }
   0xa LB: > { %3778 = sst [smem:[#allocation6_spill]] %s3163_s25  ;;  %s2695_s16 = sadd.s32 4294967295, %s3191_s15   ;;  %s3191_s15 = sphi %s3289_s15, %s26_s15   ;;  %s3187_s14 = sphi %s3287_s14, %s3819_s14   ;;  %s3183_s30 = sphi %s3285_s30, %s3818_s30   ;;  %s3179_s29 = sphi %s3283_s29, %s3817_s29   ;;  %s3175_s28 = sphi %s3281_s28, %s3816_s28   ;;  %s3171_s27 = sphi %s3279_s27, %s3815_s27   ;;  %s3167_s26 = sphi %s3277_s26, %s3814_s26   ;;  %s3163_s25 = sphi %s3275_s25, %s3813_s25  }
   0xb   : > { %3779 = sst [smem:[#allocation7_spill]] %s3167_s26  ;;  %s2696_s17 = sadd.s32 4294967294, %s3191_s15  }
   0xc   : > { %3780 = sst [smem:[#allocation8_spill]] %s3171_s27  ;;  %s35_s18 = sadd.s32 1, %s3183_s30 }
   0xd   : > { %3781 = sst [smem:[#allocation9_spill]] %s3175_s28  ;;  %p36_p0 = scmp.ge.s32.totalorder %s35_s18, 2 }
   0xe   : > { %3782 = sst [smem:[#allocation10_spill]] %s3179_s29  ;;  %s38_s19 = sadd.s32 1, %s3187_s14 }
   0xf   : > { %3783 = sst [smem:[#allocation11_spill]] %s3183_s30  ;;  %p393_p1 = scmp.ne.s32.totalorder %s3171_s27, %s3167_s26 }
  0x10   : > { %3784 = sst [smem:[#allocation12_spill]] %s3187_s14  ;;  %p394_p2 = scmp.eq.s32.totalorder %s2695_s16, 3 }
  0x11   : > { %3785 = sst [smem:[#allocation13_spill]] %s3191_s15  ;;  %s3821_s18 = smov (%p36_p0, %s35_s18), 0 }
  0x12   : > { %3786 = sst [smem:[#allocation14_spill]] %s3821_s18  ;;  %s3823_s19 = smov (!%p36_p0, %s38_s19), %s3187_s14 }
  0x13   : > { %p3324_p3 = por %p394_p2, %p393_p1  ;;  %p399_p4 = scmp.ne.s32.totalorder %s3167_s26, %s3163_s25 }
  0x14   : > { %p40_p5 = scmp.ge.s32.totalorder %s3823_s19, 2  ;;  %p400_p6 = scmp.eq.s32.totalorder %s2696_s17, 3 }
  0x15   : > { %s3787_s20 = scalar_select %p3324_p3, 1, 0 }
  0x16   : > { %p2699_p7 = scmp.ge.s32.totalorder %s3191_s15, 1  ;;  %p507_p8 = scmp.lt.s32.totalorder %s3191_s15, 5 }
  0x17   : > { %3788 = sst [smem:[#allocation15_spill]] %s3787_s20  ;;  %s3825_s19 = smov (%p40_p5, %s3823_s19), 0 }
  0x18   : > { %3789 = sst [smem:[#allocation16_spill]] %s3825_s19  ;;  %p3334_p9 = por %p400_p6, %p399_p4 }
  0x19   : > { %p508_p10 = pnand %p2699_p7, %p507_p8  ;;  %s380_s22 = ssub.s32 %s3187_s14, %s3825_s19 }
  0x1a   : > { %s3790_s21 = scalar_select %p3334_p9, 1, 0 }
  0x1b   : > { %s383_s23 = sadd.s32 1, %s3171_s27  ;;  %p381_p11 = scmp.eq.s32.totalorder %s380_s22, 0 }
  0x1c   : > { %3791 = sst [smem:[#allocation17_spill]] %s3790_s21  ;;  %511 = sbr.rel (%p508_p10) target bundleno = 2585 (0xa19), region = 72 }
  0x1d   : > { %s3342_s24 = scalar_select %p381_p11, %s3171_s27, %s383_s23  }
  0x1f   : > { %3792 = sst [smem:[#allocation18_spill]] %s3342_s24 }
  0x21   : > { %s3760_s16 = sand.u32 1, %s3167_s26   ;;  %s2701_s17 = sshll.u32 %s3179_s29, 1 }
  0x22   : > { %s2700_s18 = sshll.u32 %s3760_s16, 4  ;;  %p596_p12 = scmp.lt.s32.totalorder %s2701_s17, 3 }
  0x23   : > { %p601_p13 = scmp.lt.s32.totalorder %s3175_s28, 1  ;;  %s3793_s0 = sld [smem:[#allocation20_spill]] }
  0x24   : > { %s3827_s17 = smov (!%p596_p12, %s2701_s17), 3  ;;  %s3794_s1 = sld [smem:[#allocation21_spill]] }
  0x25   : > { %s3350_s30 = scalar_select %p601_p13, %s3175_s28, 1 }
  0x26   : > { %s2702_s22 = sshll.u32 %s3827_s17, 3  ;;  %s3796_s3 = sld [smem:[#allocation22_spill]] }
  0x27   : > { %s2756_s14 = sshll.u32 %s3350_s30, 5  ;;  %s630_s13 = scalar_lea.vmem %s3752_s8, %s3350_s30 }
  0x28   : > { %s3385_s15 = scalar_lea.vmem %s3751_s7, %s2756_s14  ;;  %s638_s19 = scalar_lea.vmem %s3754_s10, %s3350_s30 }
  0x29   : > { %s599_s16 = scalar_lea.vmem %s3793_s0, %s2702_s22  ;;  %s3409_s26 = scalar_lea.vmem [#allocation3], %s2700_s18 }
  0x2a   : > { %s3359_s21 = scalar_lea.vmem %s3794_s1, %s2756_s14  ;;  %s644_s1 = scalar_lea.vmem %s3756_s12, %s3350_s30 }
  0x2b   : > { %3795 = sst [smem:[#allocation19_spill]] %s3359_s21  ;;  %s641_s21 = scalar_lea.vmem %s3755_s11, %s3350_s30 }
  0x2c   : > { %s3368_s29 = scalar_lea.vmem %s3796_s3, %s2756_s14  ;;  %s2759_s3 = sshll.u32 %s3350_s30, 7 }
  0x2d   : > { %s3399_s0 = scalar_lea.vmem %s3753_s9, %s2759_s3  ;;  %s3797_s20 = sld [smem:[#allocation9_spill]] }
  0x33   : > { %p2711_p0 = scmp.ne.s32.totalorder %s3797_s20, 0 }
  0x35   : > { %649 = sbr.rel (%p2711_p0) target bundleno = 60 (0x3c), region = 76 }
  0x3a   : > { %v650_v0 = vld [vmem:[%s599_s16] sm:$0xff]  ;;  %vm652_vm0 = vcmask 261120   ;;  %v651_v1 = vld [vmem:[%s599_s16 + $0x8] sm:$0xff] }
  0x3b   : > { %653 = vst.msk [vmem:[#allocation2] sm:$0xff] %vm652_vm0, %v650_v0  ;;  %654 = vst.msk [vmem:[#allocation2 + $0x8] sm:$0xff] %vm652_vm0, %v651_v1 }
  0x3c PF: > { %s3798_s3 = sld [smem:[#allocation19_spill]]  ;;  %vm668_vm1 = vcmask 261120   ;;  %v3193_v9 = vmov 0.0   ;;  %s3799_s28 = scalar_lea.vmem %s3746_s2, %s3350_s30  ;;  %vm3196_vm2 = vmmov 0   ;;  %vm766_vm3 = vcmask 64512  }
  0x3d   : > { %2850 = vmatprep.subr.mxu0 %v3193_v9  ;;  %v2712_v10 = vld [vmem:[%s3799_s28] ss:$0 sm:$0xff]  ;;  %s3194_s17 = smov 112   ;;  %s3195_s22 = smov 120   ;;  %2852 = vmatprep.mubr.msk.f32.mxu0 %vm3196_vm2, %v3193_v9  ;;  %vm2095_vm4 = vcmask 130048   ;;  %vm2098_vm5 = vcmask 195584  }
  0x3e   : > { %s3197_s23 = smov 104   ;;  %s3198_s27 = smov 96  }
  0x3f   : > { %s3199_s24 = smov 64   ;;  %s3200_s14 = smov 8  }
  0x40   : > { %s3201_s25 = smov 16   ;;  %s3800_s18 = scalar_lea.vmem %s3748_s4, %s3350_s30 }
  0x41   : > { %s3801_s28 = scalar_lea.vmem %s3749_s5, %s3350_s30 }
  0x42   : > { %v660_v2 = vld [vmem:[%s3798_s3 + $0x18] sm:$0xff]  ;;  %v659_v3 = vld [vmem:[%s3798_s3 + $0x10] sm:$0xff]  ;;  %v3414_v4 = vld [vmem:[#allocation2] sm:$0xff] }
  0x43   : > { %2829 = vmatprep.subr.mxu1 %v660_v2  ;;  %v658_v5 = vld [vmem:[%s3798_s3 + $0x8] sm:$0xff]  ;;  %2837 = vmatprep.mubr.msk.f32.mxu1 %vm668_vm1, %v3414_v4  ;;  %v657_v6 = vld [vmem:[%s3798_s3] sm:$0xff]  ;;  %s3803_s3 = sld [smem:[#allocation9_spill]] }
  0x44   : > { %2830 = vmatpush3.msra.mxu1 %v660_v2  ;;  %v3420_v7 = vld [vmem:[#allocation2 + $0x8] sm:$0xff] }
  0x45   : > { %2831 = vmatprep.subr.mxu1 %v659_v3 }
  0x46   : > { %2832 = vmatpush3.msra.mxu1 %v659_v3 }
  0x47   : > { %2833 = vmatprep.subr.mxu1 %v658_v5 }
  0x48   : > { %2834 = vmatpush3.msra.mxu1 %v658_v5 }
  0x49   : > { %2835 = vmatprep.subr.mxu1 %v657_v6  ;;  %p2750_p1 = scmp.ne.s32.totalorder %s3803_s3, 1 }
  0x4a   : > { %2836 = vmatpush3.msra.mxu1 %v657_v6 }
  0x4b   : > { %2838 = vmatmul.mubr.msk.f32.vlgmr.msra.gmra.mxu1 %vm668_vm1, %v3420_v7  ;;  %2840 = vmatprep.subr.mxu1 %v3193_v9 }
  0x4c   : > { %2842 = vmatprep.mubr.msk.f32.mxu1 %vm3196_vm2, %v3193_v9 }
 0x10b   : > { %v2839_v8 = vpop.f32.mrf.mxu1 }
 0x10c   : > { %v3439_v13 = vadd.f32 %v2839_v8, %v2712_v10 }
 0x10d   : > { %v741_v11 = vpop.f32.mrf.mxu1 }
 0x10e   : > { %v3431_v12 = vadd.f32 %v2712_v10, %v741_v11 }
 0x110   : > { %756 = vrot.lane.b32.xlu1 %v3431_v12, %s3194_s17  ;;  %752 = vrot.lane.b32.xlu0 %v3431_v12, %s3195_s22 }
 0x114   : > { %758 = vrot.lane.b32.xlu1 %v3439_v13, %s3194_s17  ;;  %754 = vrot.lane.b32.xlu0 %v3439_v13, %s3195_s22 }
 0x118   : > { %762 = vrot.lane.b32.xlu1 %v3439_v13, %s3197_s23  ;;  %760 = vrot.lane.b32.xlu0 %v3431_v12, %s3197_s23  ;;  %s3802_s23 = scalar_lea.vmem %s3750_s6, %s3350_s30 }
 0x11c   : > { %841 = vrot.lane.b32.xlu1 %v3439_v13, %s3198_s27  ;;  %764 = vrot.lane.b32.xlu0 %v3431_v12, %s3198_s27 }
 0x182   : > { %v3447_v14 = vpop.permute.xlu1 %756  ;;  %v3449_v15 = vpop.permute.xlu0 %752 }
 0x183   : > { %917 = vrot.lane.b32.xlu0 %v3449_v15, %s3198_s27 }
 0x186   : > { %v3452_v16 = vpop.permute.xlu1 %758  ;;  %v3454_v17 = vpop.permute.xlu0 %754 }
 0x187   : > { %1069 = vrot.lane.b32.xlu0 %v3447_v14, %s3198_s27  ;;  %993 = vrot.lane.b32.xlu1 %v3454_v17, %s3198_s27 }
 0x18a   : > { %v3458_v18 = vpop.permute.xlu0 %760  ;;  %v3462_v19 = vpop.permute.xlu1 %762 }
 0x18b   : > { %1145 = vrot.lane.b32.xlu1 %v3452_v16, %s3198_s27  ;;  %1221 = vrot.lane.b32.xlu0 %v3458_v18, %s3198_s27 }
 0x18e   : > { %v765_v20 = vpop.permute.xlu0 %764  ;;  %v842_v21 = vpop.permute.xlu1 %841 }
 0x18f   : > { %1297 = vrot.lane.b32.xlu1 %v3462_v19, %s3198_s27  ;;  %2841 = vmatpush3.xpose.msk.msra.mxu1 %vm766_vm3, %v765_v20 }
 0x190   : > { %2845 = vmatprep.subr.mxu1 %v3193_v9 }
 0x192   : > { %2843 = vmatmul.mubr.msk.f32.vlgmr.msra.gmra.mxu1 %vm766_vm3, %v3431_v12 }
 0x193   : > { %2846 = vmatpush3.xpose.msk.msra.mxu1 %vm766_vm3, %v842_v21  ;;  %2847 = vmatprep.mubr.msk.f32.mxu1 %vm3196_vm2, %v3193_v9 }
 0x194   : > { %2855 = vmatprep.subr.mxu1 %v3193_v9 }
 0x196   : > { %2848 = vmatmul.mubr.msk.f32.vlgmr.msra.gmra.mxu1 %vm766_vm3, %v3439_v13 }
 0x197   : > { %2857 = vmatprep.mubr.msk.f32.mxu1 %vm3196_vm2, %v3193_v9 }
 0x1f5   : > { %v918_v22 = vpop.permute.xlu0 %917 }
 0x1f6   : > { %2851 = vmatpush3.xpose.msk.msra.mxu0 %vm766_vm3, %v918_v22 }
 0x1f7   : > { %2860 = vmatprep.subr.mxu0 %v3193_v9 }
 0x1f9   : > { %v994_v23 = vpop.permute.xlu1 %993  ;;  %2853 = vmatmul.mubr.msk.f32.vlgmr.msra.gmra.mxu0 %vm766_vm3, %v3449_v15  ;;  %v1070_v24 = vpop.permute.xlu0 %1069 }
 0x1fa   : > { %2856 = vmatpush3.xpose.msk.msra.mxu1 %vm766_vm3, %v994_v23  ;;  %2861 = vmatpush3.xpose.msk.msra.mxu0 %vm766_vm3, %v1070_v24 }
 0x1fb   : > { %2862 = vmatprep.mubr.msk.f32.mxu0 %vm3196_vm2, %v3193_v9  ;;  %2865 = vmatprep.subr.mxu1 %v3193_v9 }
 0x1fc   : > { %2870 = vmatprep.subr.mxu0 %v3193_v9 }
 0x1fd   : > { %v1146_v25 = vpop.permute.xlu1 %1145  ;;  %2858 = vmatmul.mubr.msk.f32.vlgmr.msra.gmra.mxu1 %vm766_vm3, %v3454_v17  ;;  %2863 = vmatmul.mubr.msk.f32.vlgmr.msra.gmra.mxu0 %vm766_vm3, %v3447_v14  ;;  %v1222_v26 = vpop.permute.xlu0 %1221 }
 0x1fe   : > { %2866 = vmatpush3.xpose.msk.msra.mxu1 %vm766_vm3, %v1146_v25  ;;  %2871 = vmatpush3.xpose.msk.msra.mxu0 %vm766_vm3, %v1222_v26 }
 0x1ff   : > { %2867 = vmatprep.mubr.msk.f32.mxu1 %vm3196_vm2, %v3193_v9  ;;  %2872 = vmatprep.mubr.msk.f32.mxu0 %vm3196_vm2, %v3193_v9 }
 0x200   : > { %2875 = vmatprep.subr.mxu1 %v3193_v9  ;;  %2880 = vmatprep.subr.mxu0 %v3193_v9 }
 0x201   : > { %v1298_v27 = vpop.permute.xlu1 %1297  ;;  %2868 = vmatmul.mubr.msk.f32.vlgmr.msra.gmra.mxu1 %vm766_vm3, %v3452_v16  ;;  %2873 = vmatmul.mubr.msk.f32.vlgmr.msra.gmra.mxu0 %vm766_vm3, %v3458_v18 }
 0x202   : > { %2876 = vmatpush3.xpose.msk.msra.mxu1 %vm766_vm3, %v1298_v27  ;;  %2877 = vmatprep.mubr.msk.f32.mxu1 %vm3196_vm2, %v3193_v9 }
 0x203   : > { %2885 = vmatprep.subr.mxu1 %v3193_v9  ;;  %2882 = vmatprep.mubr.msk.f32.mxu0 %vm3196_vm2, %v3193_v9 }
 0x205   : > { %2878 = vmatmul.mubr.msk.f32.vlgmr.msra.gmra.mxu1 %vm766_vm3, %v3462_v19 }
 0x206   : > { %2887 = vmatprep.mubr.msk.f32.mxu1 %vm3196_vm2, %v3193_v9 }
 0x252   : > { %v837_v28 = vpop.f32.mrf.mxu1 }
 0x253   : > { %v1373_v29 = vsel %vm766_vm3, %v837_v28, -inf }
 0x254   : > { %1374 = vmax.xlane.f32.xlu0 %v1373_v29  ;;  %v2844_v30 = vpop.f32.mrf.mxu1 }
 0x256   : > { %v913_v31 = vpop.f32.mrf.mxu1 }
 0x257   : > { %v1376_v32 = vsel %vm766_vm3, %v913_v31, -inf }
 0x258   : > { %1377 = vmax.xlane.f32.xlu1 %v1376_v32  ;;  %v2849_v33 = vpop.f32.mrf.mxu1 }
 0x2b9   : > { %v989_v34 = vpop.f32.mrf.mxu0 }
 0x2ba   : > { %v1379_v35 = vsel %vm766_vm3, %v989_v34, -inf }
 0x2bb   : > { %1380 = vmax.xlane.f32.xlu0 %v1379_v35  ;;  %v2854_v36 = vpop.f32.mrf.mxu0 }
 0x2bd   : > { %v1065_v37 = vpop.f32.mrf.mxu1  ;;  %v1141_v38 = vpop.f32.mrf.mxu0 }
 0x2be   : > { %v1382_v39 = vsel %vm766_vm3, %v1065_v37, -inf  ;;  %v1385_v40 = vsel %vm766_vm3, %v1141_v38, -inf }
 0x2bf   : > { %v2859_v41 = vpop.f32.mrf.mxu1  ;;  %1383 = vmax.xlane.f32.xlu0 %v1382_v39  ;;  %1386 = vmax.xlane.f32.xlu1 %v1385_v40  ;;  %v2864_v42 = vpop.f32.mrf.mxu0 }
 0x2c1   : > { %v1217_v43 = vpop.f32.mrf.mxu1  ;;  %v1293_v44 = vpop.f32.mrf.mxu0 }
 0x2c2   : > { %v1388_v45 = vsel %vm766_vm3, %v1217_v43, -inf  ;;  %v1391_v46 = vsel %vm766_vm3, %v1293_v44, -inf }
 0x2c3   : > { %v2869_v47 = vpop.f32.mrf.mxu1  ;;  %1389 = vmax.xlane.f32.xlu0 %v1388_v45  ;;  %1392 = vmax.xlane.f32.xlu1 %v1391_v46  ;;  %v2874_v48 = vpop.f32.mrf.mxu0 }
 0x2c5   : > { %v1369_v49 = vpop.f32.mrf.mxu1 }
 0x2c6   : > { %v1394_v50 = vsel %vm766_vm3, %v1369_v49, -inf }
 0x2c7   : > { %v2879_v51 = vpop.f32.mrf.mxu1  ;;  %1395 = vmax.xlane.f32.xlu0 %v1394_v50 }
 0x2d4   : > { %1461 = vrot.lane.b32.xlu1 %v3431_v12, %s3199_s24 }
 0x2d8   : > { %1613 = vrot.lane.b32.xlu1 %v3449_v15, %s3199_s24 }
 0x2dc   : > { %1689 = vrot.lane.b32.xlu1 %v3454_v17, %s3199_s24 }
 0x2dd   : > { %1537 = vrot.lane.b32.xlu0 %v3439_v13, %s3199_s24  ;;  %v1375_v54 = vpop.xlane.xlu0 %1374 }
 0x2de   : > { %v1397_v55 = vsub.f32 %v837_v28, %v1375_v54 }
 0x2e0   : > { %1841 = vrot.lane.b32.xlu1 %v3452_v16, %s3199_s24  ;;  %v1405_v57 = vmul.f32 1.442695, %v1397_v55 }
 0x2e1   : > { %1765 = vrot.lane.b32.xlu0 %v3447_v14, %s3199_s24  ;;  %v1378_v52 = vpop.xlane.xlu1 %1377 }
 0x2e2   : > { %v1398_v53 = vsub.f32 %v913_v31, %v1378_v52 }
 0x2e4   : > { %v1407_v56 = vmul.f32 1.442695, %v1398_v53 }
 0x2e6   : > { %3059 = vpow2.f32 %v1407_v56 }
 0x2e7   : > { %3061 = vpow2.f32 %v1405_v57 }
 0x2f3   : > { %v3533_v58 = vpop.eup %3059 }
 0x2f4   : > { %v1424_v59 = vsel %vm766_vm3, %v3533_v58, 0.0  ;;  %v3537_v60 = vpop.eup %3061 }
 0x2f5   : > { %v1421_v61 = vsel %vm766_vm3, %v3537_v60, 0.0 }
 0x300   : > { %1425 = vadd.xlane.f32.xlu0 %v1424_v59 }
 0x304   : > { %1422 = vadd.xlane.f32.xlu1 %v1421_v61 }
 0x344   : > { %v1381_v62 = vpop.xlane.xlu0 %1380 }
 0x345   : > { %v1399_v63 = vsub.f32 %v989_v34, %v1381_v62 }
 0x347   : > { %v1409_v0 = vmul.f32 1.442695, %v1399_v63 }
 0x348   : > { %v1387_v1 = vpop.xlane.xlu1 %1386  ;;  %v1384_v2 = vpop.xlane.xlu0 %1383 }
 0x349   : > { %3063 = vpow2.f32 %v1409_v0  ;;  %v1401_v3 = vsub.f32 %v1141_v38, %v1387_v1  ;;  %v1400_v5 = vsub.f32 %v1065_v37, %v1384_v2 }
 0x34b   : > { %v1413_v6 = vmul.f32 1.442695, %v1401_v3  ;;  %v1411_v8 = vmul.f32 1.442695, %v1400_v5  ;;  %v2104_v3 = vld [vmem:[%s3368_s29 + $0x18] sm:$0xff]  ;;  %v2103_v5 = vld [vmem:[%s3368_s29 + $0x10] sm:$0xff] }
 0x34c   : > { %v1393_v10 = vpop.xlane.xlu1 %1392  ;;  %v1390_v11 = vpop.xlane.xlu0 %1389 }
 0x34d   : > { %3065 = vpow2.f32 %v1413_v6  ;;  %v1403_v12 = vsub.f32 %v1293_v44, %v1393_v10  ;;  %v1402_v13 = vsub.f32 %v1217_v43, %v1390_v11  ;;  %v2102_v6 = vld [vmem:[%s3368_s29 + $0x8] sm:$0xff] }
 0x34e   : > { %3067 = vpow2.f32 %v1411_v8  ;;  %v2101_v8 = vld [vmem:[%s3368_s29] sm:$0xff]  ;;  %s3202_s29 = smov 24  }
 0x34f   : > { %v1417_v14 = vmul.f32 1.442695, %v1403_v12  ;;  %v1415_v15 = vmul.f32 1.442695, %v1402_v13 }
 0x350   : > { %v1462_v16 = vpop.permute.xlu1 %1461  ;;  %v1396_v17 = vpop.xlane.xlu0 %1395 }
 0x351   : > { %3069 = vpow2.f32 %v1417_v14  ;;  %v1404_v20 = vsub.f32 %v1369_v49, %v1396_v17  ;;  %2881 = vmatpush3.msra.mxu0 %v1462_v16 }
 0x352   : > { %3071 = vpow2.f32 %v1415_v15  ;;  %2890 = vmatprep.subr.mxu0 %v3193_v9 }
 0x353   : > { %v1419_v21 = vmul.f32 1.442695, %v1404_v20 }
 0x354   : > { %v1538_v22 = vpop.permute.xlu0 %1537  ;;  %v1614_v35 = vpop.permute.xlu1 %1613 }
 0x355   : > { %3073 = vpow2.f32 %v1419_v21  ;;  %2886 = vmatpush3.msra.mxu1 %v1538_v22 }
 0x356   : > { %v3064_v23 = vpop.eup %3063  ;;  %2895 = vmatprep.subr.mxu1 %v3193_v9 }
 0x357   : > { %v1427_v24 = vsel %vm766_vm3, %v3064_v23, 0.0 }
 0x358   : > { %1428 = vadd.xlane.f32.xlu1 %v1427_v24  ;;  %v1690_v36 = vpop.permute.xlu1 %1689  ;;  %v1766_v37 = vpop.permute.xlu0 %1765 }
 0x35a   : > { %v3066_v25 = vpop.eup %3065 }
 0x35b   : > { %v3068_v26 = vpop.eup %3067  ;;  %v1433_v27 = vsel %vm766_vm3, %v3066_v25, 0.0 }
 0x35c   : > { %1434 = vadd.xlane.f32.xlu1 %v1433_v27  ;;  %v1430_v28 = vsel %vm766_vm3, %v3068_v26, 0.0  ;;  %v1842_v38 = vpop.permute.xlu1 %1841 }
 0x35d   : > { %1431 = vadd.xlane.f32.xlu0 %v1430_v28 }
 0x35e   : > { %v3070_v29 = vpop.eup %3069 }
 0x35f   : > { %v3546_v30 = vpop.eup %3071  ;;  %v1439_v31 = vsel %vm766_vm3, %v3070_v29, 0.0 }
 0x360   : > { %1440 = vadd.xlane.f32.xlu1 %v1439_v31  ;;  %v1436_v32 = vsel %vm766_vm3, %v3546_v30, 0.0 }
 0x361   : > { %1437 = vadd.xlane.f32.xlu0 %v1436_v32 }
 0x362   : > { %v3551_v33 = vpop.eup %3073 }
 0x363   : > { %v1442_v34 = vsel %vm766_vm3, %v3551_v33, 0.0 }
 0x365   : > { %1443 = vadd.xlane.f32.xlu0 %v1442_v34 }
 0x371   : > { %1993 = vrot.lane.b32.xlu1 %v3462_v19, %s3199_s24 }
 0x37b   : > { %1917 = vrot.lane.b32.xlu0 %v3458_v18, %s3199_s24 }
 0x389   : > { %v1426_v39 = vpop.xlane.xlu0 %1425 }
 0x38a   : > { %3075 = vrcp.f32 %v1426_v39 }
 0x38d   : > { %v1423_v40 = vpop.xlane.xlu1 %1422 }
 0x38e   : > { %3077 = vrcp.f32 %v1423_v40 }
 0x397   : > { %v3076_v41 = vpop.eup %3075 }
 0x398   : > { %v1454_v42 = vmul.f32 %v3076_v41, %v3533_v58 }
 0x39a   : > { %2888 = vmatmul.mubr.msk.f32.vlgmr.msra.gmra.mxu1 %vm766_vm3, %v1454_v42 }
 0x39b   : > { %v3078_v43 = vpop.eup %3077  ;;  %2896 = vmatpush3.msra.mxu1 %v1690_v36  ;;  %2897 = vmatprep.mubr.msk.f32.mxu1 %vm3196_vm2, %v3193_v9 }
 0x39c   : > { %v1453_v18 = vmul.f32 %v3078_v43, %v3537_v60  ;;  %2905 = vmatprep.subr.mxu1 %v3193_v9 }
 0x39e   : > { %2883 = vmatmul.mubr.msk.f32.vlgmr.msra.gmra.mxu0 %vm766_vm3, %v1453_v18 }
 0x39f   : > { %2891 = vmatpush3.msra.mxu0 %v1614_v35  ;;  %2892 = vmatprep.mubr.msk.f32.mxu0 %vm3196_vm2, %v3193_v9  ;;  %v2739_v35 = vld [vmem:[%s3800_s18] ss:$0 sm:$0xff] }
 0x3a0   : > { %2900 = vmatprep.subr.mxu0 %v3193_v9 }
 0x3e1   : > { %v1429_v19 = vpop.xlane.xlu1 %1428 }
 0x3e2   : > { %3079 = vrcp.f32 %v1429_v19 }
 0x3e5   : > { %v1435_v44 = vpop.xlane.xlu1 %1434 }
 0x3e6   : > { %3081 = vrcp.f32 %v1435_v44  ;;  %v1432_v45 = vpop.xlane.xlu0 %1431 }
 0x3e7   : > { %3083 = vrcp.f32 %v1432_v45 }
 0x3e9   : > { %v1441_v46 = vpop.xlane.xlu1 %1440 }
 0x3ea   : > { %3085 = vrcp.f32 %v1441_v46  ;;  %v1438_v47 = vpop.xlane.xlu0 %1437 }
 0x3eb   : > { %3087 = vrcp.f32 %v1438_v47 }
 0x3ed   : > { %v1994_v60 = vpop.permute.xlu1 %1993 }
 0x3ee   : > { %v1444_v48 = vpop.xlane.xlu0 %1443 }
 0x3ef   : > { %v3080_v49 = vpop.eup %3079  ;;  %3089 = vrcp.f32 %v1444_v48 }
 0x3f0   : > { %v1455_v50 = vmul.f32 %v3080_v49, %v3064_v23 }
 0x3f2   : > { %2893 = vmatmul.mubr.msk.f32.vlgmr.msra.gmra.mxu0 %vm766_vm3, %v1455_v50  ;;  %v1918_v55 = vpop.permute.xlu0 %1917  ;;  %v2243_v50 = vld [vmem:[%s3385_s15 + $0x18] sm:$0xff] }
 0x3f3   : > { %v3082_v51 = vpop.eup %3081  ;;  %2901 = vmatpush3.msra.mxu0 %v1766_v37  ;;  %2902 = vmatprep.mubr.msk.f32.mxu0 %vm3196_vm2, %v3193_v9 }
 0x3f4   : > { %v3084_v52 = vpop.eup %3083  ;;  %2910 = vmatprep.subr.mxu0 %v3193_v9  ;;  %v1457_v53 = vmul.f32 %v3082_v51, %v3066_v25  ;;  %v2242_v51 = vld [vmem:[%s3385_s15 + $0x10] sm:$0xff] }
 0x3f5   : > { %v1456_v54 = vmul.f32 %v3084_v52, %v3068_v26  ;;  %v2241_v52 = vld [vmem:[%s3385_s15 + $0x8] sm:$0xff] }
 0x3f6   : > { %2903 = vmatmul.mubr.msk.f32.vlgmr.msra.gmra.mxu0 %vm766_vm3, %v1457_v53  ;;  %v2240_v53 = vld [vmem:[%s3385_s15] sm:$0xff] }
 0x3f7   : > { %v3086_v56 = vpop.eup %3085  ;;  %2898 = vmatmul.mubr.msk.f32.vlgmr.msra.gmra.mxu1 %vm766_vm3, %v1456_v54  ;;  %2911 = vmatpush3.msra.mxu0 %v1918_v55  ;;  %v2349_v54 = vld [vmem:[%s3399_s0 + $0x78] sm:$0xff]  ;;  %v2348_v55 = vld [vmem:[%s3399_s0 + $0x70] sm:$0xff] }
 0x3f8   : > { %v3088_v57 = vpop.eup %3087  ;;  %2906 = vmatpush3.msra.mxu1 %v1842_v38  ;;  %2907 = vmatprep.mubr.msk.f32.mxu1 %vm3196_vm2, %v3193_v9  ;;  %v1459_v58 = vmul.f32 %v3086_v56, %v3070_v29  ;;  %v2347_v56 = vld [vmem:[%s3399_s0 + $0x68] sm:$0xff] }
 0x3f9   : > { %2912 = vmatprep.mubr.msk.f32.mxu0 %vm3196_vm2, %v3193_v9  ;;  %2915 = vmatprep.subr.mxu1 %v3193_v9  ;;  %v1458_v59 = vmul.f32 %v3088_v57, %v3546_v30  ;;  %v2346_v57 = vld [vmem:[%s3399_s0 + $0x60] sm:$0xff] }
 0x3fa   : > { %2913 = vmatmul.mubr.msk.f32.vlgmr.msra.gmra.mxu0 %vm766_vm3, %v1459_v58  ;;  %2942 = vmatprep.subr.mxu0 %v2349_v54  ;;  %v2345_v58 = vld [vmem:[%s3399_s0 + $0x58] sm:$0xff] }
 0x3fb   : > { %2908 = vmatmul.mubr.msk.f32.vlgmr.msra.gmra.mxu1 %vm766_vm3, %v1458_v59  ;;  %2943 = vmatpush3.msra.mxu0 %v2349_v54  ;;  %v2344_v59 = vld [vmem:[%s3399_s0 + $0x50] sm:$0xff] }
 0x3fc   : > { %v3090_v61 = vpop.eup %3089  ;;  %2916 = vmatpush3.msra.mxu1 %v1994_v60  ;;  %2917 = vmatprep.mubr.msk.f32.mxu1 %vm3196_vm2, %v3193_v9  ;;  %v2343_v60 = vld [vmem:[%s3399_s0 + $0x48] sm:$0xff] }
 0x3fd   : > { %v1460_v62 = vmul.f32 %v3090_v61, %v3551_v33  ;;  %2920 = vmatprep.subr.mxu1 %v2104_v3  ;;  %2944 = vmatprep.subr.mxu0 %v2348_v55  ;;  %v2342_v61 = vld [vmem:[%s3399_s0 + $0x40] sm:$0xff] }
 0x3fe   : > { %2945 = vmatpush3.msra.mxu0 %v2348_v55  ;;  %v2748_v55 = vld [vmem:[%s641_s21] ss:$0 sm:$0xff] }
 0x3ff   : > { %2918 = vmatmul.mubr.msk.f32.vlgmr.msra.gmra.mxu1 %vm766_vm3, %v1460_v62  ;;  %2946 = vmatprep.subr.mxu0 %v2347_v56  ;;  %v2341_v62 = vld [vmem:[%s3399_s0 + $0x38] sm:$0xff] }
 0x400   : > { %2921 = vmatpush3.msra.mxu1 %v2104_v3  ;;  %2947 = vmatpush3.msra.mxu0 %v2347_v56 }
 0x401   : > { %2922 = vmatprep.subr.mxu1 %v2103_v5  ;;  %2948 = vmatprep.subr.mxu0 %v2346_v57 }
 0x402   : > { %2923 = vmatpush3.msra.mxu1 %v2103_v5  ;;  %2949 = vmatpush3.msra.mxu0 %v2346_v57 }
 0x403   : > { %2924 = vmatprep.subr.mxu1 %v2102_v6  ;;  %2950 = vmatprep.subr.mxu0 %v2345_v58 }
 0x404   : > { %2925 = vmatpush3.msra.mxu1 %v2102_v6  ;;  %2951 = vmatpush3.msra.mxu0 %v2345_v58  ;;  %v2749_v58 = vld [vmem:[%s644_s1] ss:$0 sm:$0xff] }
 0x405   : > { %2926 = vmatprep.subr.mxu1 %v2101_v8  ;;  %2952 = vmatprep.subr.mxu0 %v2344_v59 }
 0x406   : > { %2927 = vmatpush3.msra.mxu1 %v2101_v8  ;;  %2953 = vmatpush3.msra.mxu0 %v2344_v59 }
 0x407   : > { %2931 = vmatprep.subr.mxu1 %v2243_v50  ;;  %2954 = vmatprep.subr.mxu0 %v2343_v60 }
 0x408   : > { %2955 = vmatpush3.msra.mxu0 %v2343_v60 }
 0x409   : > { %2956 = vmatprep.subr.mxu0 %v2342_v61 }
 0x40a   : > { %2957 = vmatpush3.msra.mxu0 %v2342_v61 }
 0x40b   : > { %2958 = vmatprep.subr.mxu0 %v2341_v62 }
 0x40c   : > { %2959 = vmatpush3.msra.mxu0 %v2341_v62 }
 0x45a   : > { %v1609_v63 = vpop.f32.mrf.mxu1 }
 0x45c   : > { %v2889_v0 = vpop.f32.mrf.mxu1 }
 0x45d   : > { %v2339_v0 = vld [vmem:[%s3399_s0 + $0x28] sm:$0xff] }
 0x45e   : > { %v1533_v1 = vpop.f32.mrf.mxu0 }
 0x460   : > { %v2884_v2 = vpop.f32.mrf.mxu0 }
 0x4b2   : > { %v1685_v10 = vpop.f32.mrf.mxu0 }
 0x4b3   : > { %2071 = vrot.lane.b32.xlu0 %v1685_v10, %s3200_s14 }
 0x4b4   : > { %v2894_v9 = vpop.f32.mrf.mxu0 }
 0x4b6   : > { %v1837_v11 = vpop.f32.mrf.mxu0 }
 0x4b7   : > { %v1761_v12 = vpop.f32.mrf.mxu1  ;;  %2079 = vrot.lane.b32.xlu0 %v1837_v11, %s3201_s25  ;;  %v2742_v11 = vld [vmem:[%s3801_s28] ss:$0 sm:$0xff] }
 0x4b8   : > { %2073 = vrot.lane.b32.xlu1 %v1761_v12, %s3200_s14  ;;  %v2904_v13 = vpop.f32.mrf.mxu0 }
 0x4b9   : > { %v2899_v14 = vpop.f32.mrf.mxu1  ;;  %v2743_v13 = vld [vmem:[%s3802_s23] ss:$0 sm:$0xff] }
 0x4ba   : > { %v1989_v15 = vpop.f32.mrf.mxu0 }
 0x4bb   : > { %v1913_v16 = vpop.f32.mrf.mxu1  ;;  %2087 = vrot.lane.b32.xlu0 %v1989_v15, %s3202_s29 }
 0x4bc   : > { %2081 = vrot.lane.b32.xlu1 %v1913_v16, %s3201_s25  ;;  %v2914_v17 = vpop.f32.mrf.mxu0 }
 0x4bd   : > { %v2909_v20 = vpop.f32.mrf.mxu1 }
 0x4bf   : > { %v2065_v21 = vpop.f32.mrf.mxu1 }
 0x4c0   : > { %2089 = vrot.lane.b32.xlu1 %v2065_v21, %s3202_s29 }
 0x4c1   : > { %v2919_v22 = vpop.f32.mrf.mxu1 }
 0x4c2   : > { %v2337_v22 = vld [vmem:[%s3399_s0 + $0x18] sm:$0xff] }
 0x525   : > { %v2072_v23 = vpop.permute.xlu0 %2071 }
 0x526   : > { %v2093_v26 = vsel %vm766_vm3, %v1533_v1, %v2072_v23  ;;  %v2338_v1 = vld [vmem:[%s3399_s0 + $0x20] sm:$0xff]  ;;  %v2336_v23 = vld [vmem:[%s3399_s0 + $0x10] sm:$0xff] }
 0x529   : > { %v2080_v24 = vpop.permute.xlu0 %2079 }
 0x52a   : > { %v2074_v25 = vpop.permute.xlu1 %2073  ;;  %v2096_v27 = vsel %vm2095_vm4, %v2093_v26, %v2080_v24  ;;  %v2335_v24 = vld [vmem:[%s3399_s0 + $0x8] sm:$0xff]  ;;  %v2744_v26 = vld [vmem:[%s630_s13] ss:$0 sm:$0xff] }
 0x52b   : > { %v2094_v31 = vsel %vm766_vm3, %v1609_v63, %v2074_v25  ;;  %v2340_v63 = vld [vmem:[%s3399_s0 + $0x30] sm:$0xff]  ;;  %v2334_v25 = vld [vmem:[%s3399_s0] sm:$0xff] }
 0x52c   : > { %2960 = vmatprep.subr.mxu0 %v2340_v63 }
 0x52d   : > { %v2088_v28 = vpop.permute.xlu0 %2087  ;;  %2961 = vmatpush3.msra.mxu0 %v2340_v63 }
 0x52e   : > { %v2082_v29 = vpop.permute.xlu1 %2081  ;;  %v2099_v30 = vsel %vm2098_vm5, %v2096_v27, %v2088_v28  ;;  %2962 = vmatprep.subr.mxu0 %v2339_v0 }
 0x52f   : > { %2928 = vmatprep.mubr.msk.f32.mxu1 %vm668_vm1, %v2099_v30  ;;  %v2097_v32 = vsel %vm2095_vm4, %v2094_v31, %v2082_v29  ;;  %2963 = vmatpush3.msra.mxu0 %v2339_v0 }
 0x530   : > { %2964 = vmatprep.subr.mxu0 %v2338_v1 }
 0x531   : > { %2965 = vmatpush3.msra.mxu0 %v2338_v1 }
 0x532   : > { %v2090_v33 = vpop.permute.xlu1 %2089  ;;  %2966 = vmatprep.subr.mxu0 %v2337_v22 }
 0x533   : > { %v2100_v34 = vsel %vm2098_vm5, %v2097_v32, %v2090_v33  ;;  %2967 = vmatpush3.msra.mxu0 %v2337_v22  ;;  %v2747_v33 = vld [vmem:[%s638_s19] ss:$0 sm:$0xff] }
 0x534   : > { %2929 = vmatmul.mubr.msk.f32.vlgmr.msra.gmra.mxu1 %vm668_vm1, %v2100_v34  ;;  %2968 = vmatprep.subr.mxu0 %v2336_v23 }
 0x535   : > { %2932 = vmatpush3.msra.mxu1 %v2243_v50  ;;  %2969 = vmatpush3.msra.mxu0 %v2336_v23 }
 0x536   : > { %2933 = vmatprep.subr.mxu1 %v2242_v51  ;;  %2970 = vmatprep.subr.mxu0 %v2335_v24 }
 0x537   : > { %2934 = vmatpush3.msra.mxu1 %v2242_v51  ;;  %2971 = vmatpush3.msra.mxu0 %v2335_v24 }
 0x538   : > { %2935 = vmatprep.subr.mxu1 %v2241_v52  ;;  %2972 = vmatprep.subr.mxu0 %v2334_v25 }
 0x539   : > { %2936 = vmatpush3.msra.mxu1 %v2241_v52  ;;  %2973 = vmatpush3.msra.mxu0 %v2334_v25 }
 0x53a   : > { %2937 = vmatprep.subr.mxu1 %v2240_v53 }
 0x53b   : > { %2938 = vmatpush3.msra.mxu1 %v2240_v53 }
 0x5f4   : > { %v2930_v36 = vpop.f32.mrf.mxu1 }
 0x5f5   : > { %v2190_v37 = vadd.f32 %v2930_v36, %v2739_v35 }
 0x5f6   : > { %v2184_v38 = vpop.f32.mrf.mxu1 }
 0x5f7   : > { %v2185_v39 = vadd.f32 %v2739_v35, %v2184_v38  ;;  %v2194_v40 = vadd.f32 %v2190_v37, %v3420_v7 }
 0x5f9   : > { %v2200_v41 = vsel %vm668_vm1, %v2194_v40, 0.0  ;;  %v2193_v42 = vadd.f32 %v2185_v39, %v3414_v4 }
 0x5fa   : > { %2201 = vadd.xlane.f32.xlu1 %v2200_v41 }
 0x5fb   : > { %v2197_v43 = vsel %vm668_vm1, %v2193_v42, 0.0 }
 0x5fc   : > { %2198 = vadd.xlane.f32.xlu0 %v2197_v43 }
 0x683   : > { %v2202_v18 = vpop.xlane.xlu1 %2201 }
 0x684   : > { %v2205_v19 = vmul.f32 0.03125, %v2202_v18 }
 0x685   : > { %v2199_v44 = vpop.xlane.xlu0 %2198 }
 0x686   : > { %v2204_v45 = vmul.f32 0.03125, %v2199_v44  ;;  %v3606_v46 = vsub.f32 %v2194_v40, %v2205_v19 }
 0x688   : > { %v3608_v47 = vsub.f32 %v2193_v42, %v2204_v45  ;;  %v2209_v48 = vmul.f32 %v3606_v46, %v3606_v46 }
 0x68a   : > { %v2208_v7 = vmul.f32 %v3608_v47, %v3608_v47  ;;  %v2213_v49 = vsel %vm668_vm1, %v2209_v48, 0.0 }
 0x68c   : > { %v2210_v4 = vsel %vm668_vm1, %v2208_v7, 0.0 }
 0x68d   : > { %2211 = vadd.xlane.f32.xlu0 %v2210_v4 }
 0x691   : > { %2214 = vadd.xlane.f32.xlu0 %v2213_v49 }
 0x716   : > { %v2212_v2 = vpop.xlane.xlu0 %2211 }
 0x717   : > { %v2216_v3 = vmul.f32 0.03125, %v2212_v2 }
 0x719   : > { %v2218_v5 = vadd.f32 1e-05, %v2216_v3 }
 0x71a   : > { %v2215_v6 = vpop.xlane.xlu0 %2214 }
 0x71b   : > { %3091 = vrsqrt.f32 %v2218_v5  ;;  %v2217_v8 = vmul.f32 0.03125, %v2215_v6 }
 0x71d   : > { %v2219_v10 = vadd.f32 1e-05, %v2217_v8 }
 0x71f   : > { %3093 = vrsqrt.f32 %v2219_v10 }
 0x728   : > { %v3092_v9 = vpop.eup %3091 }
 0x729   : > { %v2222_v12 = vmul.f32 %v3092_v9, %v3608_v47 }
 0x72b   : > { %v2230_v14 = vmul.f32 %v2742_v11, %v2222_v12 }
 0x72c   : > { %v3094_v15 = vpop.eup %3093 }
 0x72d   : > { %v2223_v16 = vmul.f32 %v3094_v15, %v3606_v46  ;;  %v2238_v17 = vadd.f32 %v2743_v13, %v2230_v14 }
 0x72f   : > { %v2231_v20 = vmul.f32 %v2742_v11, %v2223_v16  ;;  %2939 = vmatprep.mubr.msk.f32.mxu1 %vm668_vm1, %v2238_v17 }
 0x731   : > { %v2239_v21 = vadd.f32 %v2743_v13, %v2231_v20 }
 0x733   : > { %2940 = vmatmul.mubr.msk.f32.vlgmr.msra.gmra.mxu1 %vm668_vm1, %v2239_v21 }
 0x7f3   : > { %v2941_v27 = vpop.f32.mrf.mxu1 }
 0x7f4   : > { %v2329_v28 = vadd.f32 %v2941_v27, %v2744_v26 }
 0x7f5   : > { %v2323_v29 = vpop.f32.mrf.mxu1 }
 0x7f6   : > { %v2324_v30 = vadd.f32 %v2744_v26, %v2323_v29  ;;  %v2333_v32 = vmax.f32 %v2329_v28, 0.0 }
 0x7f8   : > { %v2332_v31 = vmax.f32 %v2324_v30, 0.0 }
 0x7fa   : > { %2974 = vmatprep.mubr.f32.mxu0 %v2332_v31 }
 0x7fb   : > { %2975 = vmatmul.mubr.f32.vlgmr.msra.gmra.mxu0 %v2333_v32 }
 0x8bb   : > { %v2976_v34 = vpop.f32.mrf.mxu0 }
 0x8bc   : > { %v2429_v35 = vadd.f32 %v2976_v34, %v2747_v33 }
 0x8bd   : > { %v2423_v36 = vpop.f32.mrf.mxu0 }
 0x8be   : > { %v2424_v37 = vadd.f32 %v2747_v33, %v2423_v36  ;;  %v2433_v38 = vadd.f32 %v2429_v35, %v2239_v21 }
 0x8c0   : > { %v2439_v39 = vsel %vm668_vm1, %v2433_v38, 0.0  ;;  %v2432_v40 = vadd.f32 %v2424_v37, %v2238_v17 }
 0x8c1   : > { %2440 = vadd.xlane.f32.xlu0 %v2439_v39 }
 0x8c2   : > { %v2436_v41 = vsel %vm668_vm1, %v2432_v40, 0.0 }
 0x8c3   : > { %2437 = vadd.xlane.f32.xlu1 %v2436_v41 }
 0x94a   : > { %v2441_v42 = vpop.xlane.xlu0 %2440 }
 0x94b   : > { %v2443_v43 = vmul.f32 0.03125, %v2441_v42 }
 0x94c   : > { %v2438_v18 = vpop.xlane.xlu1 %2437 }
 0x94d   : > { %v2445_v19 = vsub.f32 %v2433_v38, %v2443_v43  ;;  %v2442_v44 = vmul.f32 0.03125, %v2438_v18 }
 0x94f   : > { %v2444_v45 = vsub.f32 %v2432_v40, %v2442_v44  ;;  %v2447_v46 = vmul.f32 %v2445_v19, %v2445_v19 }
 0x951   : > { %v2451_v47 = vsel %vm668_vm1, %v2447_v46, 0.0  ;;  %v2446_v7 = vmul.f32 %v2444_v45, %v2444_v45 }
 0x952   : > { %2452 = vadd.xlane.f32.xlu0 %v2451_v47 }
 0x953   : > { %v2448_v4 = vsel %vm668_vm1, %v2446_v7, 0.0 }
 0x954   : > { %2449 = vadd.xlane.f32.xlu1 %v2448_v4 }
 0x9db   : > { %v2453_v48 = vpop.xlane.xlu0 %2452 }
 0x9dc   : > { %v2455_v49 = vmul.f32 0.03125, %v2453_v48 }
 0x9dd   : > { %v2450_v50 = vpop.xlane.xlu1 %2449 }
 0x9de   : > { %v2457_v51 = vadd.f32 1e-05, %v2455_v49  ;;  %v2454_v52 = vmul.f32 0.03125, %v2450_v50 }
 0x9e0   : > { %3095 = vrsqrt.f32 %v2457_v51  ;;  %v2456_v53 = vadd.f32 1e-05, %v2454_v52 }
 0x9e2   : > { %3097 = vrsqrt.f32 %v2456_v53 }
 0x9ed   : > { %v3096_v54 = vpop.eup %3095 }
 0x9ee   : > { %v2461_v56 = vmul.f32 %v3096_v54, %v2445_v19 }
 0x9ef   : > { %v3098_v57 = vpop.eup %3097 }
 0x9f0   : > { %v2469_v59 = vmul.f32 %v2748_v55, %v2461_v56  ;;  %v2460_v60 = vmul.f32 %v3098_v57, %v2444_v45 }
 0x9f2   : > { %v2477_v61 = vadd.f32 %v2749_v58, %v2469_v59  ;;  %v2468_v62 = vmul.f32 %v2748_v55, %v2460_v60  ;;  %2483 = sbr.rel (%p2750_p1) target bundleno = 2559 (0x9ff), region = 80 }
 0x9f4   : > { %2479 = vst.msk [vmem:[#allocation2 + $0x8] sm:$0xff] %vm668_vm1, %v2477_v61  ;;  %v2476_v63 = vadd.f32 %v2749_v58, %v2468_v62 }
 0x9f6   : > { %2478 = vst.msk [vmem:[#allocation2] sm:$0xff] %vm668_vm1, %v2476_v63 }
 0x9fb   : > { %v2485_v1 = vld [vmem:[#allocation2 + $0x8] sm:$0xff] }
 0x9fc   : > { %2487 = vst.msk [vmem:[%s3409_s26 + $0x8] sm:$0xff] %vm668_vm1, %v2485_v1 }
 0x9fd   : > { %v2484_v0 = vld [vmem:[#allocation2] sm:$0xff] }
 0x9fe   : > { %2486 = vst.msk [vmem:[%s3409_s26] sm:$0xff] %vm668_vm1, %v2484_v0 }
 0x9ff PF: > { %s3804_s1 = sld [smem:[#allocation10_spill]]  ;;  %s2502_s23 = sshll.u32 %s3409_s26, 4  ;;  %s3688_s23 = int_to_ptr.vmem [resolvable:$true] %s2502_s23 }
 0xa00   : > { %s3805_s30 = sld [smem:[#allocation7_spill]]  ;;  %s3099_s25 = scalar_lea.vmem %s3688_s23, 256 }
 0xa01   : > { %s3807_s28 = sld [smem:[#allocation23_spill]]  ;;  %p3100_p2 = scmp.ne.s32.totalorder %s3688_s23, %s3099_s25 }
 0xa02   : > { %s3203_s29 = smov [#allocation3]  }
 0xa03   : > { %p3101_p4 = pnand %p3100_p2, %p3324_p3  ;;  %s3103_s0 = sshll.u32 %s3203_s29, 4  ;;  %s3104_s0 = int_to_ptr.vmem [resolvable:$false] %s3103_s0 }
 0xa04   : > { %s3105_s13 = scalar_lea.vmem %s3104_s0, 512  ;;  %p3106_p6 = scmp.lt.s32.totalorder %s3688_s23, %s3104_s0 }
 0xa05   : > { %s2760_s18 = sshll.u32 %s3804_s1, 8  ;;  %p3102_p5 = pneg %p3101_p4 }
 0xa06   : > { %s3809_s27 = sand.u32 1, %s3805_s30   ;;  %p3107_p7 = scmp.lt.s32.totalorder %s3105_s13, %s3099_s25 }
 0xa07   : > { %s3808_s17 = smov %s3807_s28  ;;  %s3685_s22 = scalar_lea.hbm %s3807_s28, %s2760_s18 }
 0xa08   : > { %s3692_s24 = scalar_lea.sflag [#allocation4], %s3809_s27  ;;  %p3108_p8 = por %p3107_p7, %p3106_p6 }
 0xa0a   : > { %p3109_p10 = pnand %p3108_p8, %p3102_p5 }
 0xa0c   : > { %3112 = shalt.err (!%p3109_p10)
}
 0xa0d   : > { %s3113_s26 = scalar_lea.hbm %s3685_s22, 256  ;;  %s3117_s3 = scalar_lea.hbm %s3808_s17, 512 }
 0xa0e   : > { %p3114_p11 = scmp.ne.s32.totalorder %s3685_s22, %s3113_s26  ;;  %p3118_p0 = scmp.lt.s32.totalorder %s3685_s22, %s3808_s17 }
 0xa0f   : > { %p3119_p1 = scmp.lt.s32.totalorder %s3117_s3, %s3113_s26 }
 0xa10   : > { %p3115_p12 = pnand %p3114_p11, %p3324_p3 }
 0xa11   : > { %p3120_p2 = por %p3119_p1, %p3118_p0 }
 0xa12   : > { %p3116_p13 = pneg %p3115_p12 }
 0xa14   : > { %p3121_p4 = pnand %p3120_p2, %p3116_p13 }
 0xa16   : > { %3124 = shalt.err (!%p3121_p4)
}
 0xa17   : > { %s3204_s18 = smov 128  }
 0xa18   : > { %2977 = dma.vmem_to_hbm [thread:$0]  (%p3324_p3), %s3688_s23, 256, %s3685_s22, %s3692_s24, %s3204_s18, %s3204_s18, %s3200_s14  }
 0xa19 PF: > { %s3810_s15 = sld [smem:[#allocation13_spill]] }
 0xa1a   : > { %s3811_s16 = sld [smem:[#allocation6_spill]] }
 0xa1f   : > { %p2983_p5 = scmp.ge.s32.totalorder %s3810_s15, 2 }
 0xa20   : > { %s2517_s27 = sand.u32 1, %s3811_s16  }
 0xa21   : > { %p2980_p6 = pnand %p2983_p5, %p3334_p9  ;;  %s2518_s25 = scalar_lea.sflag [#allocation4], %s2517_s27 }
 0xa23   : > { %p2981_p7 = pneg %p2980_p6 }
 0xa25   : > { %3158 = dma.done.wait (%p2981_p7), %s2518_s25, 256  }
 0xa26   : > { %3160 = vsyncadd (%p2981_p7), %s2518_s25, 4294967040  ;;  %s26_s15 = sadd.s32 1, %s3810_s15   ;;  %s3813_s25 = sld [smem:[#allocation7_spill]] }
 0xa27   : > { %p23_p8 = scmp.ge.s32.totalorder %s26_s15, 6   ;;  %s3814_s26 = sld [smem:[#allocation8_spill]] }
 0xa28   : > { %s3815_s27 = sld [smem:[#allocation18_spill]] }
 0xa29   : > { %s3816_s28 = sld [smem:[#allocation11_spill]]  ;;  %25 = sbr.rel (!%p23_p8) target bundleno = 10 (0xa), region = 151 }
 0xa2a   : > { %s3817_s29 = sld [smem:[#allocation12_spill]] }
 0xa2b   : > { %s3818_s30 = sld [smem:[#allocation14_spill]] }
 0xa2c   : > { %s3819_s14 = sld [smem:[#allocation16_spill]] }
 0xa2e   :  { %2523 = vsyncpa [#allocation4], 1 }
 0xa2f   :  { %2525 = vsyncpa [#allocation4 + $0x1], 1 }

</bundles_post_ra>
